<compile_context>
chip_gen: v5e
topology: v5e:2x2
jax: 0.10.0
libtpu: 0.0.40
codegen_flags: <defaults>
</compile_context>

<pallas_src>
import functools

import jax
import jax.numpy as jnp
from jax.experimental import pallas as pl
from jax.experimental.pallas import tpu as pltpu

_BN_EPS = 1e-5
_LANE = 128
_VMEM_LIMIT = 32 * 1024 * 1024   # safe scoped-VMEM budget on v5e/v6e/v7x


def _round_up(x, m):
    return (x + m - 1) // m * m


# ---------------------------------------------------------------------------
# Kernels
# ---------------------------------------------------------------------------
def _make_conv_stats_kernel(m_valid, tm, apply_pre_act, compute_dtype):
    """Conv (one folded-K MXU dot) + bias, plus masked per-tile BN statistics.

    If `apply_pre_act`, the previous block's BatchNorm+ReLU is applied to the
    incoming patch tile (per-column scale/shift, tiled over the 9 taps) before
    the matmul — this fuses BN1+ReLU into conv2's prologue.
    """
    def body(p_ref, w_ref, b_ref, ps_ref, pb_ref, out_ref, stats_ref):
        # p_ref  : (TM, K)      compute_dtype   (K = 9*Cin)
        # w_ref  : (K, Cpad)    compute_dtype   (grid-resident)
        # b_ref  : (1, Cpad)    f32             (grid-resident)
        # ps_ref : (1, K)       f32  (pre-activation scale) | None
        # pb_ref : (1, K)       f32  (pre-activation shift) | None
        # out_ref: (TM, Cpad)   compute_dtype  (raw conv + bias)
        # stats  : (1, 2, Cpad) f32  (row 0 = sum, row 1 = sum of squares)
        x = p_ref[...]
        if apply_pre_act:
            xf = x.astype(jnp.float32)
            xf = jnp.maximum(xf * ps_ref[...] + pb_ref[...], 0.0)
            x = xf.astype(compute_dtype)

        acc = jnp.dot(x, w_ref[...], preferred_element_type=jnp.float32)
        acc = acc + b_ref[...]
        out_ref[...] = acc.astype(out_ref.dtype)

        # Masked single-pass moments: exclude the zero-padded tail rows of M
        # (their conv output equals the bias, so they must not pollute BN stats).
        row = pl.program_id(0) * tm + jax.lax.broadcasted_iota(
            jnp.int32, (tm, 1), 0)
        valid = (row < m_valid).astype(jnp.float32)
        accm = acc * valid
        s = jnp.sum(accm, axis=0, keepdims=True)          # (1, Cpad)
        ss = jnp.sum(accm * acc, axis=0, keepdims=True)   # (1, Cpad)
        stats_ref[0] = jnp.concatenate([s, ss], axis=0)   # (2, Cpad)

    if apply_pre_act:
        def kernel(p_ref, w_ref, b_ref, ps_ref, pb_ref, out_ref, stats_ref):
            body(p_ref, w_ref, b_ref, ps_ref, pb_ref, out_ref, stats_ref)
    else:
        def kernel(p_ref, w_ref, b_ref, out_ref, stats_ref):
            body(p_ref, w_ref, b_ref, None, None, out_ref, stats_ref)
    return kernel


def _bn_relu_kernel(y_ref, scale_ref, shift_ref, o_ref):
    # Pass 2: folded BN affine + ReLU, lane-dense (Cpad = multiple of 128).
    y = y_ref[...].astype(jnp.float32)
    o_ref[...] = jnp.maximum(y * scale_ref[...] + shift_ref[...],
                             0.0).astype(o_ref.dtype)


# ---------------------------------------------------------------------------
# pallas_call wrappers
# ---------------------------------------------------------------------------
def _conv_stats(patches, w_fold, bias_pad, pre_scale, pre_shift, *,
                m_valid, tm, apply_pre_act, compute_dtype):
    mp, k = patches.shape
    cpad = w_fold.shape[1]
    n_tiles = mp // tm
    kernel = _make_conv_stats_kernel(m_valid, tm, apply_pre_act, compute_dtype)

    in_specs = [
        pl.BlockSpec((tm, k), lambda i: (i, 0)),       # patch tile
        pl.BlockSpec((k, cpad), lambda i: (0, 0)),     # folded weights (resident)
        pl.BlockSpec((1, cpad), lambda i: (0, 0)),     # conv bias
    ]
    args = [patches.astype(compute_dtype), w_fold.astype(compute_dtype), bias_pad]
    if apply_pre_act:
        in_specs += [pl.BlockSpec((1, k), lambda i: (0, 0)),   # pre-act scale
                     pl.BlockSpec((1, k), lambda i: (0, 0))]   # pre-act shift
        args += [pre_scale, pre_shift]

    return pl.pallas_call(
        kernel,
        out_shape=(jax.ShapeDtypeStruct((mp, cpad), compute_dtype),
                   jax.ShapeDtypeStruct((n_tiles, 2, cpad), jnp.float32)),
        grid=(n_tiles,),
        in_specs=in_specs,
        out_specs=(
            pl.BlockSpec((tm, cpad), lambda i: (i, 0)),        # raw conv tile
            pl.BlockSpec((1, 2, cpad), lambda i: (i, 0, 0)),   # per-tile moments
        ),
        compiler_params=pltpu.CompilerParams(
            dimension_semantics=("parallel",),
            vmem_limit_bytes=_VMEM_LIMIT),
    )(*args)


def _bn_relu_apply(y_raw, scale, shift, *, tm):
    mp, cpad = y_raw.shape
    n_tiles = mp // tm
    return pl.pallas_call(
        _bn_relu_kernel,
        out_shape=jax.ShapeDtypeStruct((mp, cpad), jnp.float32),
        grid=(n_tiles,),
        in_specs=[pl.BlockSpec((tm, cpad), lambda i: (i, 0)),
                  pl.BlockSpec((1, cpad), lambda i: (0, 0)),
                  pl.BlockSpec((1, cpad), lambda i: (0, 0))],
        out_specs=pl.BlockSpec((tm, cpad), lambda i: (i, 0)),
        compiler_params=pltpu.CompilerParams(
            dimension_semantics=("parallel",),
            vmem_limit_bytes=_VMEM_LIMIT),
    )(y_raw, scale.reshape(1, cpad), shift.reshape(1, cpad))


# ---------------------------------------------------------------------------
# JAX glue (layout plumbing only)
# ---------------------------------------------------------------------------
def _im2col_3x3(x):
    """x: (N, H, W, C) -> (N*(H-2)*(W-2), 9*C), tap-major / channel-minor."""
    n, h, w, c = x.shape
    ho, wo = h - 2, w - 2
    m = n * ho * wo
    # TODO(synk): this still materializes a 9x-duplicated patch slab in HBM; a
    # halo-tiled manual-DMA variant would remove that traffic.
    cols = [x[:, kh:kh + ho, kw:kw + wo, :].reshape(m, c)
            for kh in range(3) for kw in range(3)]
    return jnp.concatenate(cols, axis=1), (n, ho, wo)


def _fold_weight(w_oihw, cpad):
    """(Cout, Cin, 3, 3) -> (9*Cin, Cpad), zero-padded output channels."""
    cout, cin = w_oihw.shape[0], w_oihw.shape[1]
    w = jnp.transpose(w_oihw, (2, 3, 1, 0)).reshape(9 * cin, cout)
    return jnp.pad(w, ((0, 0), (0, cpad - cout))).astype(jnp.float32)


def _finalize_stats(stats, m_valid, gamma_pad, beta_pad):
    """Reduce per-tile moments -> folded BN scale/shift (per padded channel)."""
    s = jnp.sum(stats[:, 0, :], axis=0)
    ss = jnp.sum(stats[:, 1, :], axis=0)
    mean = s / m_valid
    var = jnp.maximum(ss / m_valid - mean * mean, 0.0)   # f32, biased, clamped
    scale = gamma_pad * jax.lax.rsqrt(var + _BN_EPS)
    shift = beta_pad - mean * scale
    return scale, shift


def double_conv(x_nchw, params, *, compute_dtype=jnp.bfloat16, tm=512):
    """DoubleConv forward (training-mode BN). x: (N, Cin, H, W) -> (N, Cout, H-4, W-4)."""
    (w1, b1, g1, be1, w2, b2, g2, be2) = params
    cmid, cin = w1.shape[0], w1.shape[1]
    cout = w2.shape[0]
    cpad1 = _round_up(cmid, _LANE)
    cpad2 = _round_up(cout, _LANE)

    # NCHW -> NHWC; cast to compute dtype before im2col so the patch slab is
    # built (and DMA'd) directly at MXU operand width.
    x = jnp.transpose(x_nchw, (0, 2, 3, 1)).astype(compute_dtype)

    # ---- block 1: conv1 + bias and batch statistics (BN1/ReLU deferred) ----
    p1, (n, ho1, wo1) = _im2col_3x3(x)
    m1 = p1.shape[0]
    mp1 = _round_up(m1, tm)
    p1 = jnp.pad(p1, ((0, mp1 - m1), (0, 0)))
    wf1 = _fold_weight(w1, cpad1)
    b1p = jnp.pad(b1, (0, cpad1 - cmid)).reshape(1, cpad1).astype(jnp.float32)
    h_raw, st1 = _conv_stats(p1, wf1, b1p, None, None,
                             m_valid=m1, tm=tm, apply_pre_act=False,
                             compute_dtype=compute_dtype)
    g1p = jnp.pad(g1, (0, cpad1 - cmid)).astype(jnp.float32)
    be1p = jnp.pad(be1, (0, cpad1 - cmid)).astype(jnp.float32)
    scale1, shift1 = _finalize_stats(st1, m1, g1p, be1p)

    # ---- block 2: fused BN1+ReLU prologue + conv2 + bias and statistics ----
    h = h_raw[:m1].reshape(n, ho1, wo1, cpad1)[..., :cmid]   # trim pad rows/cols
    p2, (_, ho2, wo2) = _im2col_3x3(h)
    m2 = p2.shape[0]
    mp2 = _round_up(m2, tm)
    p2 = jnp.pad(p2, ((0, mp2 - m2), (0, 0)))
    wf2 = _fold_weight(w2, cpad2)
    b2p = jnp.pad(b2, (0, cpad2 - cout)).reshape(1, cpad2).astype(jnp.float32)
    pre_s = jnp.tile(scale1[:cmid], 9).reshape(1, 9 * cmid)   # tap-major layout
    pre_b = jnp.tile(shift1[:cmid], 9).reshape(1, 9 * cmid)
    y_raw, st2 = _conv_stats(p2, wf2, b2p, pre_s, pre_b,
                             m_valid=m2, tm=tm, apply_pre_act=True,
                             compute_dtype=compute_dtype)
    g2p = jnp.pad(g2, (0, cpad2 - cout)).astype(jnp.float32)
    be2p = jnp.pad(be2, (0, cpad2 - cout)).astype(jnp.float32)
    scale2, shift2 = _finalize_stats(st2, m2, g2p, be2p)

    # ---- pass 2: BN2 affine + ReLU (lane-dense elementwise sweep) ----
    y = _bn_relu_apply(y_raw, scale2, shift2, tm=tm)
    y = y[:m2, :cout].reshape(n, ho2, wo2, cout)
    return jnp.transpose(y, (0, 3, 1, 2))                    # NHWC -> NCHW


# ---------------------------------------------------------------------------
# Pure-JAX reference matching PyTorch DoubleConv (training-mode BatchNorm)
# ---------------------------------------------------------------------------
def _reference(x_nchw, params):
    (w1, b1, g1, be1, w2, b2, g2, be2) = params

    def block(x, w, b, g, be):
        y = jax.lax.conv_general_dilated(
            x, w, window_strides=(1, 1), padding='VALID',
            dimension_numbers=('NCHW', 'OIHW', 'NCHW'))
        y = y + b[None, :, None, None]
        mean = jnp.mean(y, axis=(0, 2, 3), keepdims=True)
        var = jnp.mean((y - mean) ** 2, axis=(0, 2, 3), keepdims=True)
        y = (y - mean) * jax.lax.rsqrt(var + _BN_EPS)
        y = y * g[None, :, None, None] + be[None, :, None, None]
        return jnp.maximum(y, 0.0)

    h = block(x_nchw, w1, b1, g1, be1)
    return block(h, w2, b2, g2, be2)


if __name__ == "__main__":
    N, Cin, H, W = 2, 4, 16, 16
    Cmid, Cout = 8, 8            # mid_channels defaults to out_channels

    key = jax.random.PRNGKey(0)
    k = jax.random.split(key, 6)
    x = jax.random.normal(k[0], (N, Cin, H, W), jnp.float32)
    w1 = jax.random.normal(k[1], (Cmid, Cin, 3, 3), jnp.float32) * 0.2
    b1 = jax.random.normal(k[2], (Cmid,), jnp.float32) * 0.1
    w2 = jax.random.normal(k[3], (Cout, Cmid, 3, 3), jnp.float32) * 0.2
    b2 = jax.random.normal(k[4], (Cout,), jnp.float32) * 0.1
    g1 = jnp.ones((Cmid,), jnp.float32)      # BatchNorm default weight = 1
    be1 = jnp.zeros((Cmid,), jnp.float32)    # BatchNorm default bias   = 0
    g2 = jnp.ones((Cout,), jnp.float32)
    be2 = jnp.zeros((Cout,), jnp.float32)
    params = (w1, b1, g1, be1, w2, b2, g2, be2)

    fwd = jax.jit(double_conv, static_argnames=("compute_dtype", "tm"))

    ref = jax.block_until_ready(_reference(x, params))

    # f32 compute path: tight numerical check of the tiled/two-pass structure.
    out_f32 = jax.block_until_ready(
        fwd(x, params, compute_dtype=jnp.float32, tm=128))
    assert out_f32.shape == (N, Cout, H - 4, W - 4), out_f32.shape
    assert jnp.allclose(out_f32, ref, rtol=2e-3, atol=2e-3), float(
        jnp.max(jnp.abs(out_f32 - ref)))

    # bf16 MXU path (default / perf path): looser tolerance for bf16 operand
    # rounding through two stacked conv + batch-norm stages.
    out_bf16 = jax.block_until_ready(
        fwd(x, params, compute_dtype=jnp.bfloat16, tm=256))
    assert out_bf16.shape == (N, Cout, H - 4, W - 4), out_bf16.shape
    assert jnp.allclose(out_bf16, ref, rtol=1e-1, atol=1e-1), float(
        jnp.max(jnp.abs(out_bf16 - ref)))

    print("KERNEL_OK")
</pallas_src>

<mosaic_0001>
module attributes {stable_mosaic.version = 11 : i64} {
  func.func @kernel(%arg0: i32, %arg1: memref<128x36xf32, #tpu.memory_space<vmem>>, %arg2: memref<36x128xf32, #tpu.memory_space<vmem>>, %arg3: memref<1x128xf32, #tpu.memory_space<vmem>>, %arg4: memref<128x128xf32, #tpu.memory_space<vmem>>, %arg5: memref<1x2x128xf32, #tpu.memory_space<vmem>>) attributes {dimension_semantics = [#tpu.dimension_semantics<parallel>], iteration_bounds = array<i64: 4>, scalar_prefetch = 0 : i64, scratch_operands = 0 : i64, tpu.core_type = #tpu.core_type<tc>, window_params = [{transform_indices = @transform_0, window_bounds = array<i64: 128, 36>}, {pipeline_mode = #tpu.pipeline_mode<synchronous>, transform_indices = @transform_1, window_bounds = array<i64: 36, 128>}, {pipeline_mode = #tpu.pipeline_mode<synchronous>, transform_indices = @transform_2, window_bounds = array<i64: 1, 128>}, {transform_indices = @transform_3, window_bounds = array<i64: 128, 128>}, {transform_indices = @transform_4, window_bounds = array<i64: 1, 2, 128>}]} {
    %c0 = arith.constant 0 : index
    %c0_0 = arith.constant 0 : index
    %0 = vector.load %arg1[%c0, %c0_0] : memref<128x36xf32, #tpu.memory_space<vmem>>, vector<128x36xf32>
    %c0_1 = arith.constant 0 : index
    %c0_2 = arith.constant 0 : index
    %1 = vector.load %arg2[%c0_1, %c0_2] : memref<36x128xf32, #tpu.memory_space<vmem>>, vector<36x128xf32>
    %cst = arith.constant dense<0.000000e+00> : vector<128x128xf32>
    %2 = tpu.matmul %0, %1, %cst {dimension_numbers = #tpu.dot_dimension_numbers<[1], [0], [0], [1], [0, 0, 1, 1], [], []>} : vector<128x36xf32>, vector<36x128xf32>, vector<128x128xf32> -> vector<128x128xf32>
    %c0_3 = arith.constant 0 : index
    %c0_4 = arith.constant 0 : index
    %3 = vector.load %arg3[%c0_3, %c0_4] : memref<1x128xf32, #tpu.memory_space<vmem>>, vector<1x128xf32>
    %4 = vector.broadcast %3 : vector<1x128xf32> to vector<128x128xf32>
    %5 = arith.addf %2, %4 : vector<128x128xf32>
    %c0_5 = arith.constant 0 : index
    %c0_6 = arith.constant 0 : index
    %6 = vector.load %arg4[%c0_5, %c0_6] : memref<128x128xf32, #tpu.memory_space<vmem>>, vector<128x128xf32>
    tpu.vector_store %arg4[%c0_5, %c0_6], %5 {strides = array<i32>} : memref<128x128xf32, #tpu.memory_space<vmem>>, vector<128x128xf32>,
    %c128_i32 = arith.constant 128 : i32
    %7 = arith.muli %arg0, %c128_i32 : i32
    %8 = tpu.iota {dimensions = array<i32: 0>} : vector<128x1xi32>
    %9 = vector.broadcast %7 : i32 to vector<128x1xi32>
    %10 = arith.addi %9, %8 : vector<128x1xi32>
    %c392_i32 = arith.constant 392 : i32
    %11 = vector.broadcast %c392_i32 : i32 to vector<128x1xi32>
    %12 = arith.cmpi slt, %10, %11 : vector<128x1xi32>
    %13 = arith.extui %12 : vector<128x1xi1> to vector<128x1xi32>
    %14 = arith.sitofp %13 : vector<128x1xi32> to vector<128x1xf32>
    %15 = vector.broadcast %14 : vector<128x1xf32> to vector<128x128xf32>
    %16 = arith.mulf %5, %15 : vector<128x128xf32>
    %cst_7 = arith.constant dense<0.000000e+00> : vector<128xf32>
    %17 = vector.multi_reduction <add>, %16, %cst_7 [0] : vector<128x128xf32> to vector<128xf32>
    %18 = vector.shape_cast %17 : vector<128xf32> to vector<1x128xf32>
    %19 = arith.mulf %16, %5 : vector<128x128xf32>
    %cst_8 = arith.constant dense<0.000000e+00> : vector<128xf32>
    %20 = vector.multi_reduction <add>, %19, %cst_8 [0] : vector<128x128xf32> to vector<128xf32>
    %21 = vector.shape_cast %20 : vector<128xf32> to vector<1x128xf32>
    %22 = tpu.concatenate %18, %21 in 0 : vector<1x128xf32>, vector<1x128xf32> -> vector<2x128xf32>
    %c0_9 = arith.constant 0 : index
    %c0_10 = arith.constant 0 : index
    %c0_11 = arith.constant 0 : index
    %23 = vector.load %arg5[%c0_9, %c0_10, %c0_11] : memref<1x2x128xf32, #tpu.memory_space<vmem>>, vector<1x2x128xf32>
    %24 = vector.shape_cast %23 : vector<1x2x128xf32> to vector<2x128xf32>
    %25 = vector.shape_cast %22 : vector<2x128xf32> to vector<1x2x128xf32>
    tpu.vector_store %arg5[%c0_9, %c0_10, %c0_11], %25 {strides = array<i32>} : memref<1x2x128xf32, #tpu.memory_space<vmem>>, vector<1x2x128xf32>,
    return
  }
  func.func @transform_0(%arg0: i32) -> (i32, i32) {
    %c0_i32 = arith.constant 0 : i32
    %c0_i32_0 = arith.constant 0 : i32
    return %arg0, %c0_i32 : i32, i32
  }
  func.func @transform_1(%arg0: i32) -> (i32, i32) {
    %c0_i32 = arith.constant 0 : i32
    %c0_i32_0 = arith.constant 0 : i32
    %c0_i32_1 = arith.constant 0 : i32
    return %c0_i32, %c0_i32_0 : i32, i32
  }
  func.func @transform_2(%arg0: i32) -> (i32, i32) {
    %c0_i32 = arith.constant 0 : i32
    %c0_i32_0 = arith.constant 0 : i32
    %c0_i32_1 = arith.constant 0 : i32
    return %c0_i32, %c0_i32_0 : i32, i32
  }
  func.func @transform_3(%arg0: i32) -> (i32, i32) {
    %c0_i32 = arith.constant 0 : i32
    %c0_i32_0 = arith.constant 0 : i32
    return %arg0, %c0_i32 : i32, i32
  }
  func.func @transform_4(%arg0: i32) -> (i32, i32, i32) {
    %c0_i32 = arith.constant 0 : i32
    %c0_i32_0 = arith.constant 0 : i32
    %c0_i32_1 = arith.constant 0 : i32
    return %arg0, %c0_i32, %c0_i32_0 : i32, i32, i32
  }
}

module attributes {stable_mosaic.version = 11 : i64} {
  func.func @kernel(%arg0: i32, %arg1: memref<128x72xf32, #tpu.memory_space<vmem>>, %arg2: memref<72x128xf32, #tpu.memory_space<vmem>>, %arg3: memref<1x128xf32, #tpu.memory_space<vmem>>, %arg4: memref<1x72xf32, #tpu.memory_space<vmem>>, %arg5: memref<1x72xf32, #tpu.memory_space<vmem>>, %arg6: memref<128x128xf32, #tpu.memory_space<vmem>>, %arg7: memref<1x2x128xf32, #tpu.memory_space<vmem>>) attributes {dimension_semantics = [#tpu.dimension_semantics<parallel>], iteration_bounds = array<i64: 3>, scalar_prefetch = 0 : i64, scratch_operands = 0 : i64, tpu.core_type = #tpu.core_type<tc>, window_params = [{transform_indices = @transform_0, window_bounds = array<i64: 128, 72>}, {pipeline_mode = #tpu.pipeline_mode<synchronous>, transform_indices = @transform_1, window_bounds = array<i64: 72, 128>}, {pipeline_mode = #tpu.pipeline_mode<synchronous>, transform_indices = @transform_2, window_bounds = array<i64: 1, 128>}, {pipeline_mode = #tpu.pipeline_mode<synchronous>, transform_indices = @transform_3, window_bounds = array<i64: 1, 72>}, {pipeline_mode = #tpu.pipeline_mode<synchronous>, transform_indices = @transform_4, window_bounds = array<i64: 1, 72>}, {transform_indices = @transform_5, window_bounds = array<i64: 128, 128>}, {transform_indices = @transform_6, window_bounds = array<i64: 1, 2, 128>}]} {
    %c0 = arith.constant 0 : index
    %c0_0 = arith.constant 0 : index
    %0 = vector.load %arg1[%c0, %c0_0] : memref<128x72xf32, #tpu.memory_space<vmem>>, vector<128x72xf32>
    %c0_1 = arith.constant 0 : index
    %c0_2 = arith.constant 0 : index
    %1 = vector.load %arg4[%c0_1, %c0_2] : memref<1x72xf32, #tpu.memory_space<vmem>>, vector<1x72xf32>
    %2 = vector.broadcast %1 : vector<1x72xf32> to vector<128x72xf32>
    %3 = arith.mulf %0, %2 : vector<128x72xf32>
    %c0_3 = arith.constant 0 : index
    %c0_4 = arith.constant 0 : index
    %4 = vector.load %arg5[%c0_3, %c0_4] : memref<1x72xf32, #tpu.memory_space<vmem>>, vector<1x72xf32>
    %5 = vector.broadcast %4 : vector<1x72xf32> to vector<128x72xf32>
    %6 = arith.addf %3, %5 : vector<128x72xf32>
    %cst = arith.constant 0.000000e+00 : f32
    %7 = vector.broadcast %cst : f32 to vector<128x72xf32>
    %8 = arith.maximumf %6, %7 : vector<128x72xf32>
    %c0_5 = arith.constant 0 : index
    %c0_6 = arith.constant 0 : index
    %9 = vector.load %arg2[%c0_5, %c0_6] : memref<72x128xf32, #tpu.memory_space<vmem>>, vector<72x128xf32>
    %cst_7 = arith.constant dense<0.000000e+00> : vector<128x128xf32>
    %10 = tpu.matmul %8, %9, %cst_7 {dimension_numbers = #tpu.dot_dimension_numbers<[1], [0], [0], [1], [0, 0, 1, 1], [], []>} : vector<128x72xf32>, vector<72x128xf32>, vector<128x128xf32> -> vector<128x128xf32>
    %c0_8 = arith.constant 0 : index
    %c0_9 = arith.constant 0 : index
    %11 = vector.load %arg3[%c0_8, %c0_9] : memref<1x128xf32, #tpu.memory_space<vmem>>, vector<1x128xf32>
    %12 = vector.broadcast %11 : vector<1x128xf32> to vector<128x128xf32>
    %13 = arith.addf %10, %12 : vector<128x128xf32>
    %c0_10 = arith.constant 0 : index
    %c0_11 = arith.constant 0 : index
    %14 = vector.load %arg6[%c0_10, %c0_11] : memref<128x128xf32, #tpu.memory_space<vmem>>, vector<128x128xf32>
    tpu.vector_store %arg6[%c0_10, %c0_11], %13 {strides = array<i32>} : memref<128x128xf32, #tpu.memory_space<vmem>>, vector<128x128xf32>,
    %c128_i32 = arith.constant 128 : i32
    %15 = arith.muli %arg0, %c128_i32 : i32
    %16 = tpu.iota {dimensions = array<i32: 0>} : vector<128x1xi32>
    %17 = vector.broadcast %15 : i32 to vector<128x1xi32>
    %18 = arith.addi %17, %16 : vector<128x1xi32>
    %c288_i32 = arith.constant 288 : i32
    %19 = vector.broadcast %c288_i32 : i32 to vector<128x1xi32>
    %20 = arith.cmpi slt, %18, %19 : vector<128x1xi32>
    %21 = arith.extui %20 : vector<128x1xi1> to vector<128x1xi32>
    %22 = arith.sitofp %21 : vector<128x1xi32> to vector<128x1xf32>
    %23 = vector.broadcast %22 : vector<128x1xf32> to vector<128x128xf32>
    %24 = arith.mulf %13, %23 : vector<128x128xf32>
    %cst_12 = arith.constant dense<0.000000e+00> : vector<128xf32>
    %25 = vector.multi_reduction <add>, %24, %cst_12 [0] : vector<128x128xf32> to vector<128xf32>
    %26 = vector.shape_cast %25 : vector<128xf32> to vector<1x128xf32>
    %27 = arith.mulf %24, %13 : vector<128x128xf32>
    %cst_13 = arith.constant dense<0.000000e+00> : vector<128xf32>
    %28 = vector.multi_reduction <add>, %27, %cst_13 [0] : vector<128x128xf32> to vector<128xf32>
    %29 = vector.shape_cast %28 : vector<128xf32> to vector<1x128xf32>
    %30 = tpu.concatenate %26, %29 in 0 : vector<1x128xf32>, vector<1x128xf32> -> vector<2x128xf32>
    %c0_14 = arith.constant 0 : index
    %c0_15 = arith.constant 0 : index
    %c0_16 = arith.constant 0 : index
    %31 = vector.load %arg7[%c0_14, %c0_15, %c0_16] : memref<1x2x128xf32, #tpu.memory_space<vmem>>, vector<1x2x128xf32>
    %32 = vector.shape_cast %31 : vector<1x2x128xf32> to vector<2x128xf32>
    %33 = vector.shape_cast %30 : vector<2x128xf32> to vector<1x2x128xf32>
    tpu.vector_store %arg7[%c0_14, %c0_15, %c0_16], %33 {strides = array<i32>} : memref<1x2x128xf32, #tpu.memory_space<vmem>>, vector<1x2x128xf32>,
    return
  }
  func.func @transform_0(%arg0: i32) -> (i32, i32) {
    %c0_i32 = arith.constant 0 : i32
    %c0_i32_0 = arith.constant 0 : i32
    return %arg0, %c0_i32 : i32, i32
  }
  func.func @transform_1(%arg0: i32) -> (i32, i32) {
    %c0_i32 = arith.constant 0 : i32
    %c0_i32_0 = arith.constant 0 : i32
    %c0_i32_1 = arith.constant 0 : i32
    return %c0_i32, %c0_i32_0 : i32, i32
  }
  func.func @transform_2(%arg0: i32) -> (i32, i32) {
    %c0_i32 = arith.constant 0 : i32
    %c0_i32_0 = arith.constant 0 : i32
    %c0_i32_1 = arith.constant 0 : i32
    return %c0_i32, %c0_i32_0 : i32, i32
  }
  func.func @transform_3(%arg0: i32) -> (i32, i32) {
    %c0_i32 = arith.constant 0 : i32
    %c0_i32_0 = arith.constant 0 : i32
    %c0_i32_1 = arith.constant 0 : i32
    return %c0_i32, %c0_i32_0 : i32, i32
  }
  func.func @transform_4(%arg0: i32) -> (i32, i32) {
    %c0_i32 = arith.constant 0 : i32
    %c0_i32_0 = arith.constant 0 : i32
    %c0_i32_1 = arith.constant 0 : i32
    return %c0_i32, %c0_i32_0 : i32, i32
  }
  func.func @transform_5(%arg0: i32) -> (i32, i32) {
    %c0_i32 = arith.constant 0 : i32
    %c0_i32_0 = arith.constant 0 : i32
    return %arg0, %c0_i32 : i32, i32
  }
  func.func @transform_6(%arg0: i32) -> (i32, i32, i32) {
    %c0_i32 = arith.constant 0 : i32
    %c0_i32_0 = arith.constant 0 : i32
    %c0_i32_1 = arith.constant 0 : i32
    return %arg0, %c0_i32, %c0_i32_0 : i32, i32, i32
  }
}

module attributes {stable_mosaic.version = 11 : i64} {
  func.func @_bn_relu_kernel(%arg0: i32, %arg1: memref<128x128xf32, #tpu.memory_space<vmem>>, %arg2: memref<1x128xf32, #tpu.memory_space<vmem>>, %arg3: memref<1x128xf32, #tpu.memory_space<vmem>>, %arg4: memref<128x128xf32, #tpu.memory_space<vmem>>) attributes {dimension_semantics = [#tpu.dimension_semantics<parallel>], iteration_bounds = array<i64: 3>, scalar_prefetch = 0 : i64, scratch_operands = 0 : i64, tpu.core_type = #tpu.core_type<tc>, window_params = [{transform_indices = @transform_0, window_bounds = array<i64: 128, 128>}, {pipeline_mode = #tpu.pipeline_mode<synchronous>, transform_indices = @transform_1, window_bounds = array<i64: 1, 128>}, {pipeline_mode = #tpu.pipeline_mode<synchronous>, transform_indices = @transform_2, window_bounds = array<i64: 1, 128>}, {transform_indices = @transform_3, window_bounds = array<i64: 128, 128>}]} {
    %c0 = arith.constant 0 : index
    %c0_0 = arith.constant 0 : index
    %0 = vector.load %arg1[%c0, %c0_0] : memref<128x128xf32, #tpu.memory_space<vmem>>, vector<128x128xf32>
    %c0_1 = arith.constant 0 : index
    %c0_2 = arith.constant 0 : index
    %1 = vector.load %arg2[%c0_1, %c0_2] : memref<1x128xf32, #tpu.memory_space<vmem>>, vector<1x128xf32>
    %2 = vector.broadcast %1 : vector<1x128xf32> to vector<128x128xf32>
    %3 = arith.mulf %0, %2 : vector<128x128xf32>
    %c0_3 = arith.constant 0 : index
    %c0_4 = arith.constant 0 : index
    %4 = vector.load %arg3[%c0_3, %c0_4] : memref<1x128xf32, #tpu.memory_space<vmem>>, vector<1x128xf32>
    %5 = vector.broadcast %4 : vector<1x128xf32> to vector<128x128xf32>
    %6 = arith.addf %3, %5 : vector<128x128xf32>
    %cst = arith.constant 0.000000e+00 : f32
    %7 = vector.broadcast %cst : f32 to vector<128x128xf32>
    %8 = arith.maximumf %6, %7 : vector<128x128xf32>
    %c0_5 = arith.constant 0 : index
    %c0_6 = arith.constant 0 : index
    %9 = vector.load %arg4[%c0_5, %c0_6] : memref<128x128xf32, #tpu.memory_space<vmem>>, vector<128x128xf32>
    tpu.vector_store %arg4[%c0_5, %c0_6], %8 {strides = array<i32>} : memref<128x128xf32, #tpu.memory_space<vmem>>, vector<128x128xf32>,
    return
  }
  func.func @transform_0(%arg0: i32) -> (i32, i32) {
    %c0_i32 = arith.constant 0 : i32
    %c0_i32_0 = arith.constant 0 : i32
    return %arg0, %c0_i32 : i32, i32
  }
  func.func @transform_1(%arg0: i32) -> (i32, i32) {
    %c0_i32 = arith.constant 0 : i32
    %c0_i32_0 = arith.constant 0 : i32
    %c0_i32_1 = arith.constant 0 : i32
    return %c0_i32, %c0_i32_0 : i32, i32
  }
  func.func @transform_2(%arg0: i32) -> (i32, i32) {
    %c0_i32 = arith.constant 0 : i32
    %c0_i32_0 = arith.constant 0 : i32
    %c0_i32_1 = arith.constant 0 : i32
    return %c0_i32, %c0_i32_0 : i32, i32
  }
  func.func @transform_3(%arg0: i32) -> (i32, i32) {
    %c0_i32 = arith.constant 0 : i32
    %c0_i32_0 = arith.constant 0 : i32
    return %arg0, %c0_i32 : i32, i32
  }
}

</mosaic_0001>

<bundles_post_ra>
// kernel: tile.13
= control target key start
LH: loop header
LB: loop body
LE: loop exit
PB: predicated region body
PF: predicated region fallthrough
CT: control target
= control target key end

     0   :  { %s28_s0 = inlined_call_operand.vmem [shape: f32[8], index: 0, kind: input, shape index: {}]   ;;  %s29_s1 = inlined_call_operand.vmem [shape: f32[9,8], index: 1, kind: output, shape index: {}]  }
   0x1   :  { %v4_v0 = vld [vmem:[%s28_s0] ss:$0 sm:$0xff] }
   0x2   :  { %5 = vst [vmem:[%s29_s1] sm:$0xff] %v4_v0 }
   0x3   :  { %8 = vst [vmem:[%s29_s1 + $0x8] sm:$0xff] %v4_v0 }

// kernel: tile.14
= control target key start
LH: loop header
LB: loop body
LE: loop exit
PB: predicated region body
PF: predicated region fallthrough
CT: control target
= control target key end

     0   :  { %s75_s10 = smov 64   ;;  %s76_s11 = smov 48   ;;  %vm3_vm0 = vcmask 64512   ;;  %vm9_vm1 = vcmask 589312   ;;  %vm15_vm2 = vcmask 523712   ;;  %vm21_vm3 = vcmask 458112   ;;  %s123_s0 = inlined_call_operand.vmem [shape: f32[9,8], index: 0, kind: input, shape index: {}]   ;;  %s124_s1 = inlined_call_operand.vmem [shape: f32[1,72], index: 1, kind: output, shape index: {}]  }
   0x1   :  { %v59_v0 = vld [vmem:[%s123_s0 + $0x8] sm:$0x1]   ;;  %v61_v1 = vld [vmem:[%s123_s0 + $0x6] sm:$0x1]   ;;  %v63_v2 = vld [vmem:[%s123_s0 + $0x4] sm:$0x1]  }
   0x2   :  { %7 = vrot.lane.b32.xlu0 %v59_v0, %s75_s10  ;;  %19 = vrot.lane.b32.xlu1 %v61_v1, %s76_s11  ;;  %s77_s14 = smov 32   ;;  %v60_v3 = vld [vmem:[%s123_s0 + $0x7] sm:$0x1]   ;;  %v62_v4 = vld [vmem:[%s123_s0 + $0x5] sm:$0x1]   ;;  %s78_s19 = smov 56  }
   0x3   :  { %31 = vrot.lane.b32.xlu2 %v63_v2, %s77_s14  ;;  %s79_s20 = smov 40   ;;  %v64_v5 = vld [vmem:[%s123_s0 + $0x3] sm:$0x1]   ;;  %s80_s23 = smov 24   ;;  %v65_v6 = vld [vmem:[%s123_s0 + $0x2] sm:$0x1]  }
   0x4   :  { %v66_v7 = vld [vmem:[%s123_s0 + $0x1] sm:$0x1]   ;;  %s81_s28 = smov 16   ;;  %s82_s29 = smov 8   ;;  %v2_v8 = vld [vmem:[%s123_s0] sm:$0x1]  }
   0x5   :  { %4 = vst.msk [vmem:[#allocation0] sm:$0x1] %vm3_vm0, %v2_v8   ;;  %vm27_vm4 = vcmask 392512   ;;  %vm33_vm5 = vcmask 326912   ;;  %vm39_vm6 = vcmask 261312   ;;  %vm45_vm7 = vcmask 195712  }
   0x6   :  { %vm51_vm8 = vcmask 130112  }
   0xa   :  { %13 = vrot.lane.b32.xlu0 %v60_v3, %s78_s19  ;;  %25 = vrot.lane.b32.xlu1 %v62_v4, %s79_s20 }
   0xb   :  { %37 = vrot.lane.b32.xlu2 %v64_v5, %s80_s23 }
  0x12   :  { %43 = vrot.lane.b32.xlu0 %v65_v6, %s81_s28  ;;  %49 = vrot.lane.b32.xlu1 %v66_v7, %s82_s29 }
  0x5d   :  { %v32_v9 = vpop.permute.xlu2 %31  }
  0x65   :  { %v38_v10 = vpop.permute.xlu2 %37  }
  0x74   :  { %v8_v11 = vpop.permute.xlu0 %7   ;;  %v20_v12 = vpop.permute.xlu1 %19  }
  0x75   :  { %10 = vst.msk [vmem:[#allocation0] sm:$0x1] %vm9_vm1, %v8_v11  }
  0x7c   :  { %v14_v13 = vpop.permute.xlu0 %13   ;;  %v26_v14 = vpop.permute.xlu1 %25  }
  0x7d   :  { %16 = vst.msk [vmem:[#allocation0] sm:$0x1] %vm15_vm2, %v14_v13  }
  0x7e   :  { %22 = vst.msk [vmem:[#allocation0] sm:$0x1] %vm21_vm3, %v20_v12  }
  0x7f   :  { %28 = vst.msk [vmem:[#allocation0] sm:$0x1] %vm27_vm4, %v26_v14  }
  0x80   :  { %34 = vst.msk [vmem:[#allocation0] sm:$0x1] %vm33_vm5, %v32_v9  }
  0x81   :  { %40 = vst.msk [vmem:[#allocation0] sm:$0x1] %vm39_vm6, %v38_v10  }
  0x84   :  { %v44_v15 = vpop.permute.xlu0 %43   ;;  %v50_v16 = vpop.permute.xlu1 %49  }
  0x85   :  { %46 = vst.msk [vmem:[#allocation0] sm:$0x1] %vm45_vm7, %v44_v15  }
  0x86   :  { %52 = vst.msk [vmem:[#allocation0] sm:$0x1] %vm51_vm8, %v50_v16  }
  0x8d   :  { %v55_v17 = vld [vmem:[#allocation0] sm:$0x1] }
  0x8e   :  { %58 = vst [vmem:[%s124_s1] sm:$0x1] %v55_v17 }

// kernel: double_conv.3
= control target key start
LH: loop header
LB: loop body
LE: loop exit
PB: predicated region body
PF: predicated region fallthrough
CT: control target
= control target key end

     0   :  { %s723_s15 = smov 0   ;;  %s953_s0 = inlined_call_operand.vmem [shape: f32[512,36], index: 0, kind: input, shape index: {}]   ;;  %s954_s1 = inlined_call_operand.vmem [shape: f32[36,128], index: 1, kind: input, shape index: {}]   ;;  %s955_s2 = inlined_call_operand.vmem [shape: f32[1,128], index: 2, kind: input, shape index: {}]   ;;  %s956_s3 = inlined_call_operand.vmem [shape: f32[512,128], index: 3, kind: output, shape index: {0}]   ;;  %s957_s4 = inlined_call_operand.vmem [shape: f32[4,2,128], index: 4, kind: output, shape index: {1}]  }
   0x1 LB: > { %s729_s16 = sadd.s32 4294967295, %s695_s15   ;;  %p622_p0 = scmp.ge.s32.totalorder %s695_s15, 1  ;;  %s695_s15 = sphi %s723_s15, %s15_s15  }
   0x2   : > { %p166_p1 = scmp.lt.s32.totalorder %s695_s15, 5 }
   0x4   : > { %p167_p2 = pnand %p622_p0, %p166_p1 }
   0x5   : > { %s623_s21 = sshll.u32 (!%p167_p2), %s729_s16, 4  ;;  %s645_s11 = sshll.u32 (!%p167_p2), %s729_s16, 7 }
   0x6   : > { %170 = sbr.rel (%p167_p2) target bundleno = 217 (0xd9), region = 32  ;;  %p197_p3 = scmp.lt.s32.totalorder (!%p167_p2), %s623_s21, 63 }
   0x7   : > { %p208_p4 = scmp.lt.s32.totalorder (!%p167_p2), %s729_s16, 3 }
   0xb   : > { %v232_v0 = vld [vmem:[%s954_s1 + $0x20] sm:$0xf]  ;;  %vm286_vm0 = vcmask 1043456   ;;  %v231_v1 = vld [vmem:[%s954_s1 + $0x18] sm:$0xff]  ;;  %v230_v2 = vld [vmem:[%s954_s1 + $0x10] sm:$0xff]  ;;  %s959_s21 = smov (!%p197_p3, %s623_s21), 63  ;;  %v372_v22 = vlaneseq  ;;  %v817_v29 = vstv %s645_s11 }
   0xc   : > { %628 = vmatpush.msk.msra.mxu0 %vm286_vm0, %v232_v0  ;;  %664 = vmatpush.msk.msra.mxu1 %vm286_vm0, %v232_v0  ;;  %v229_v3 = vld [vmem:[%s954_s1 + $0x8] sm:$0xff]  ;;  %s624_s26 = sshll.u32 %s959_s21, 3  ;;  %v228_v4 = vld [vmem:[%s954_s1] sm:$0xff]  ;;  %vm237_vm1 = vcmask 293888   ;;  %v697_v47 = vmov 0.0   ;;  %s961_s16 = smov (!%p208_p4, %s729_s16), 3 }
   0xd   : > { %665 = vmatpush.msk.msra.mxu2 %vm286_vm0, %v232_v0  ;;  %666 = vmatpush.msk.msra.mxu3 %vm286_vm0, %v232_v0  ;;  %s757_s5 = scalar_lea.vmem %s953_s0, %s624_s26  ;;  %v794_v21 = vld [vmem:[%s955_s2] ss:$0 sm:$0xff]  ;;  %s801_s10 = scalar_lea.vmem %s956_s3, %s624_s26  ;;  %v811_v27 = vshrl.u32 %v372_v22, 7 }
   0xe   : > { %302 = vmatpush.msra.mxu0 %v231_v1  ;;  %667 = vmatpush.msra.mxu1 %v231_v1  ;;  %v212_v5 = vld [vmem:[%s757_s5] sm:$0xff]  ;;  %v213_v9 = vld [vmem:[%s757_s5 + $0x8] sm:$0xff]  ;;  %v214_v13 = vld [vmem:[%s757_s5 + $0x10] sm:$0xff]  ;;  %s627_s12 = sshll.u32 %s961_s16, 1 }
   0xf   : > { %668 = vmatpush.msra.mxu2 %v231_v1  ;;  %669 = vmatpush.msra.mxu3 %v231_v1  ;;  %v216_v6 = vld [vmem:[%s757_s5 + $0x20] sm:$0xff]  ;;  %v217_v10 = vld [vmem:[%s757_s5 + $0x28] sm:$0xff]  ;;  %v218_v14 = vld [vmem:[%s757_s5 + $0x30] sm:$0xff]  ;;  %v374_v28 = vadd.s32 8, %v811_v27  ;;  %v375_v30 = vadd.s32 16, %v811_v27  ;;  %v390_v37 = vadd.s32 %v817_v29, %v811_v27  ;;  %v377_v38 = vadd.s32 32, %v811_v27  ;;  %s211_s17 = scalar_lea.vmem %s957_s4, %s627_s12 }
  0x10   : > { %303 = vmatpush.msra.mxu0 %v230_v2  ;;  %670 = vmatpush.msra.mxu1 %v230_v2  ;;  %v220_v7 = vld [vmem:[%s757_s5 + $0x40] sm:$0xff]  ;;  %v221_v11 = vld [vmem:[%s757_s5 + $0x48] sm:$0xff]  ;;  %v222_v15 = vld [vmem:[%s757_s5 + $0x50] sm:$0xff]  ;;  %v378_v42 = vadd.s32 40, %v811_v27  ;;  %v376_v44 = vadd.s32 24, %v811_v27  ;;  %v381_v46 = vadd.s32 64, %v811_v27 }
  0x11   : > { %671 = vmatpush.msra.mxu2 %v230_v2  ;;  %672 = vmatpush.msra.mxu3 %v230_v2  ;;  %v224_v8 = vld [vmem:[%s757_s5 + $0x60] sm:$0xff]  ;;  %v225_v12 = vld [vmem:[%s757_s5 + $0x68] sm:$0xff]  ;;  %v226_v16 = vld [vmem:[%s757_s5 + $0x70] sm:$0xff]  ;;  %v391_v34 = vadd.s32 %v817_v29, %v374_v28  ;;  %v392_v41 = vadd.s32 %v817_v29, %v375_v30  ;;  %vm406_vm3 = vcmp.lt.s32.totalorder %v390_v37, 392  ;;  %v394_v45 = vadd.s32 %v817_v29, %v377_v38 }
  0x12   : > { %304 = vmatpush.msra.mxu0 %v229_v3  ;;  %673 = vmatpush.msra.mxu1 %v229_v3  ;;  %v215_v17 = vld [vmem:[%s757_s5 + $0x18] sm:$0xff]  ;;  %v395_v49 = vadd.s32 %v817_v29, %v378_v42  ;;  %v379_v52 = vadd.s32 48, %v811_v27  ;;  %v382_v53 = vadd.s32 72, %v811_v27  ;;  %v646_v54 = vsel %vm406_vm3, 1.0, %v697_v47 }
  0x13   : > { %674 = vmatpush.msra.mxu2 %v229_v3  ;;  %675 = vmatpush.msra.mxu3 %v229_v3  ;;  %v219_v18 = vld [vmem:[%s757_s5 + $0x38] sm:$0xff]  ;;  %vm407_vm2 = vcmp.lt.s32.totalorder %v391_v34, 392  ;;  %vm408_vm4 = vcmp.lt.s32.totalorder %v392_v41, 392  ;;  %v393_v57 = vadd.s32 %v817_v29, %v376_v44  ;;  %vm410_vm5 = vcmp.lt.s32.totalorder %v394_v45, 392 }
  0x14   : > { %305 = vmatpush.msra.mxu0 %v228_v4  ;;  %676 = vmatpush.msra.mxu1 %v228_v4  ;;  %v223_v19 = vld [vmem:[%s757_s5 + $0x58] sm:$0xff]  ;;  %v647_v48 = vsel %vm407_vm2, 1.0, %v697_v47  ;;  %v648_v59 = vsel %vm408_vm4, 1.0, %v697_v47  ;;  %v380_v61 = vadd.s32 56, %v811_v27  ;;  %v398_v63 = vadd.s32 %v817_v29, %v381_v46 }
  0x15   : > { %629 = vmatmul.msk.f32.vlgmr.msra.gmra.mxu0 %vm237_vm1, %v212_v5  ;;  %633 = vmatmul.msk.f32.vlgmr.msra.gmra.mxu1 %vm237_vm1, %v216_v6  ;;  %v227_v20 = vld [vmem:[%s757_s5 + $0x78] sm:$0xff]  ;;  %v385_v1 = vadd.s32 96, %v811_v27  ;;  %vm411_vm6 = vcmp.lt.s32.totalorder %v395_v49, 392  ;;  %v396_v2 = vadd.s32 %v817_v29, %v379_v52  ;;  %v399_v3 = vadd.s32 %v817_v29, %v382_v53 }
  0x16   : > { %677 = vmatpush.msra.mxu2 %v228_v4  ;;  %678 = vmatpush.msra.mxu3 %v228_v4  ;;  %vm409_vm7 = vcmp.lt.s32.totalorder %v393_v57, 392  ;;  %vm414_vm8 = vcmp.lt.s32.totalorder %v398_v63, 392  ;;  %v384_v28 = vadd.s32 88, %v811_v27  ;;  %v388_v63 = vadd.s32 120, %v811_v27 }
  0x17   : > { %637 = vmatmul.msk.f32.vlgmr.msra.gmra.mxu2 %vm237_vm1, %v220_v7  ;;  %641 = vmatmul.msk.f32.vlgmr.msra.gmra.mxu3 %vm237_vm1, %v224_v8  ;;  %v650_v7 = vsel %vm410_vm5, 1.0, %v697_v47  ;;  %v397_v8 = vadd.s32 %v817_v29, %v380_v61  ;;  %vm412_vm9 = vcmp.lt.s32.totalorder %v396_v2, 392  ;;  %vm415_vm10 = vcmp.lt.s32.totalorder %v399_v3, 392 }
  0x18   : > { %v654_v44 = vsel %vm414_vm8, 1.0, %v697_v47  ;;  %v401_v46 = vadd.s32 %v817_v29, %v384_v28  ;;  %v655_v52 = vsel %vm415_vm10, 1.0, %v697_v47  ;;  %vm528_vm2 = vcmask 1040384  }
  0x19   : > { %vm413_vm11 = vcmp.lt.s32.totalorder %v397_v8, 392 }
  0x1a   : > { %v653_v45 = vsel %vm413_vm11, 1.0, %v697_v47  ;;  %vm417_vm14 = vcmp.lt.s32.totalorder %v401_v46, 392 }
  0x1d   : > { %630 = vmatmul.msk.f32.gmra.mxu0 %vm237_vm1, %v213_v9  ;;  %634 = vmatmul.msk.f32.gmra.mxu1 %vm237_vm1, %v217_v10  ;;  %v651_v10 = vsel %vm411_vm6, 1.0, %v697_v47 }
  0x1f   : > { %638 = vmatmul.msk.f32.gmra.mxu2 %vm237_vm1, %v221_v11  ;;  %642 = vmatmul.msk.f32.gmra.mxu3 %vm237_vm1, %v225_v12  ;;  %v881_v11 = vadd.s32 %v817_v29, %v385_v1 }
  0x21   : > { %vm418_vm12 = vcmp.lt.s32.totalorder %v881_v11, 392 }
  0x25   : > { %631 = vmatmul.msk.f32.gmra.mxu0 %vm237_vm1, %v214_v13  ;;  %635 = vmatmul.msk.f32.gmra.mxu1 %vm237_vm1, %v218_v14  ;;  %v649_v13 = vsel %vm409_vm7, 1.0, %v697_v47 }
  0x27   : > { %639 = vmatmul.msk.f32.gmra.mxu2 %vm237_vm1, %v222_v15  ;;  %643 = vmatmul.msk.f32.gmra.mxu3 %vm237_vm1, %v226_v16  ;;  %v383_v15 = vadd.s32 80, %v811_v27 }
  0x29   : > { %v400_v34 = vadd.s32 %v817_v29, %v383_v15 }
  0x2b   : > { %vm416_vm13 = vcmp.lt.s32.totalorder %v400_v34, 392 }
  0x2d   : > { %632 = vmatmul.msk.f32.gmra.mxu0 %vm237_vm1, %v215_v17  ;;  %636 = vmatmul.msk.f32.gmra.mxu1 %vm237_vm1, %v219_v18 }
  0x2f   : > { %640 = vmatmul.msk.f32.gmra.mxu2 %vm237_vm1, %v223_v19  ;;  %644 = vmatmul.msk.f32.gmra.mxu3 %vm237_vm1, %v227_v20 }
  0x92   : > { %v307_v23 = vpop.f32.mrf.mxu0  ;;  %v319_v24 = vpop.f32.mrf.mxu1 }
  0x93   : > { %v804_v25 = vadd.f32 %v794_v21, %v307_v23  ;;  %v807_v26 = vadd.f32 %v794_v21, %v319_v24 }
  0x95   : > { %355 = vst [vmem:[%s801_s10] sm:$0xff] %v804_v25  ;;  %v454_v5 = vmul.f32 %v646_v54, %v804_v25  ;;  %v458_v23 = vmul.f32 %v650_v7, %v807_v26  ;;  %v387_v54 = vadd.s32 112, %v811_v27 }
  0x96   : > { %359 = vst [vmem:[%s801_s10 + $0x20] sm:$0xff] %v807_v26 }
  0x97   : > { %v491_v16 = vmul.f32 %v454_v5, %v804_v25 }
  0x9a   : > { %v310_v31 = vpop.f32.mrf.mxu0  ;;  %v322_v32 = vpop.f32.mrf.mxu1 }
  0x9b   : > { %v311_v33 = vadd.f32 %v794_v21, %v310_v31  ;;  %v331_v35 = vpop.f32.mrf.mxu2  ;;  %v343_v36 = vpop.f32.mrf.mxu3  ;;  %v826_v39 = vadd.f32 %v794_v21, %v322_v32 }
  0x9c   : > { %v830_v40 = vadd.f32 %v794_v21, %v331_v35  ;;  %v837_v43 = vadd.f32 %v794_v21, %v343_v36  ;;  %v386_v35 = vadd.s32 104, %v811_v27  ;;  %v658_v27 = vsel %vm418_vm12, 1.0, %v697_v47 }
  0x9d   : > { %356 = vst [vmem:[%s801_s10 + $0x8] sm:$0xff] %v311_v33  ;;  %v455_v62 = vmul.f32 %v647_v48, %v311_v33  ;;  %v459_v37 = vmul.f32 %v651_v10, %v826_v39  ;;  %v495_v48 = vmul.f32 %v458_v23, %v807_v26 }
  0x9e   : > { %360 = vst [vmem:[%s801_s10 + $0x28] sm:$0xff] %v826_v39  ;;  %v403_v53 = vadd.s32 %v817_v29, %v386_v35  ;;  %v462_v61 = vmul.f32 %v654_v44, %v830_v40  ;;  %v466_v11 = vmul.f32 %v658_v27, %v837_v43 }
  0x9f   : > { %363 = vst [vmem:[%s801_s10 + $0x40] sm:$0xff] %v830_v40  ;;  %v492_v9 = vmul.f32 %v455_v62, %v311_v33  ;;  %v470_v17 = vadd.f32 %v455_v62, %v454_v5  ;;  %v652_v33 = vsel %vm412_vm9, 1.0, %v697_v47 }
  0xa0   : > { %367 = vst [vmem:[%s801_s10 + $0x60] sm:$0xff] %v837_v43  ;;  %vm419_vm15 = vcmp.lt.s32.totalorder %v403_v53, 392 }
  0xa1   : > { %v507_v30 = vadd.f32 %v492_v9, %v491_v16 }
  0xa2   : > { %v313_v50 = vpop.f32.mrf.mxu0  ;;  %v325_v51 = vpop.f32.mrf.mxu1 }
  0xa3   : > { %v314_v55 = vadd.f32 %v794_v21, %v313_v50  ;;  %v334_v56 = vpop.f32.mrf.mxu2  ;;  %v346_v58 = vpop.f32.mrf.mxu3  ;;  %v855_v60 = vadd.f32 %v794_v21, %v325_v51 }
  0xa4   : > { %v861_v0 = vadd.f32 %v794_v21, %v334_v56  ;;  %v869_v4 = vadd.f32 %v794_v21, %v346_v58 }
  0xa5   : > { %357 = vst [vmem:[%s801_s10 + $0x10] sm:$0xff] %v314_v55  ;;  %v456_v6 = vmul.f32 %v648_v59, %v314_v55  ;;  %v460_v49 = vmul.f32 %v652_v33, %v855_v60 }
  0xa6   : > { %361 = vst [vmem:[%s801_s10 + $0x30] sm:$0xff] %v855_v60  ;;  %v463_v7 = vmul.f32 %v655_v52, %v861_v0 }
  0xa7   : > { %364 = vst [vmem:[%s801_s10 + $0x48] sm:$0xff] %v861_v0  ;;  %v493_v18 = vmul.f32 %v456_v6, %v314_v55  ;;  %v471_v31 = vadd.f32 %v470_v17, %v456_v6  ;;  %v496_v55 = vmul.f32 %v459_v37, %v826_v39  ;;  %v497_v1 = vmul.f32 %v460_v49, %v855_v60 }
  0xa8   : > { %368 = vst [vmem:[%s801_s10 + $0x68] sm:$0xff] %v869_v4  ;;  %v656_v39 = vsel %vm416_vm13, 1.0, %v697_v47  ;;  %v404_v6 = vadd.s32 %v817_v29, %v387_v54  ;;  %v405_v60 = vadd.s32 %v817_v29, %v388_v63  ;;  %v500_v16 = vmul.f32 %v463_v7, %v861_v0 }
  0xa9   : > { %v508_v38 = vadd.f32 %v507_v30, %v493_v18 }
  0xaa   : > { %v316_v12 = vpop.f32.mrf.mxu0  ;;  %v328_v14 = vpop.f32.mrf.mxu1  ;;  %vm420_vm0 = vcmp.lt.s32.totalorder %v404_v6, 392  ;;  %vm421_vm1 = vcmp.lt.s32.totalorder %v405_v60, 392 }
  0xab   : > { %v317_v19 = vadd.f32 %v794_v21, %v316_v12  ;;  %v337_v20 = vpop.f32.mrf.mxu2  ;;  %v349_v22 = vpop.f32.mrf.mxu3  ;;  %v329_v24 = vadd.f32 %v794_v21, %v328_v14  ;;  %v499_v12 = vmul.f32 %v462_v61, %v830_v40  ;;  %v660_v29 = vsel %vm420_vm0, 1.0, %v697_v47 }
  0xac   : > { %v338_v25 = vadd.f32 %v794_v21, %v337_v20  ;;  %v898_v36 = vadd.f32 %v794_v21, %v349_v22  ;;  %v659_v20 = vsel %vm419_vm15, 1.0, %v697_v47  ;;  %v661_v0 = vsel %vm421_vm1, 1.0, %v697_v47 }
  0xad   : > { %358 = vst [vmem:[%s801_s10 + $0x18] sm:$0xff] %v317_v19  ;;  %v457_v32 = vmul.f32 %v649_v13, %v317_v19  ;;  %v461_v57 = vmul.f32 %v653_v45, %v329_v24  ;;  %v467_v28 = vmul.f32 %v659_v20, %v869_v4 }
  0xae   : > { %362 = vst [vmem:[%s801_s10 + $0x38] sm:$0xff] %v329_v24  ;;  %v464_v15 = vmul.f32 %v656_v39, %v338_v25  ;;  %v468_v35 = vmul.f32 %v660_v29, %v898_v36 }
  0xaf   : > { %v472_v41 = vadd.f32 %v471_v31, %v457_v32  ;;  %v494_v42 = vmul.f32 %v457_v32, %v317_v19  ;;  %365 = vst [vmem:[%s801_s10 + $0x50] sm:$0xff] %v338_v25  ;;  %v498_v9 = vmul.f32 %v461_v57, %v329_v24  ;;  %v503_v32 = vmul.f32 %v466_v11, %v837_v43 }
  0xb0   : > { %369 = vst [vmem:[%s801_s10 + $0x70] sm:$0xff] %v898_v36  ;;  %v505_v44 = vmul.f32 %v468_v35, %v898_v36 }
  0xb1   : > { %v473_v50 = vadd.f32 %v472_v41, %v458_v23  ;;  %v509_v51 = vadd.f32 %v508_v38, %v494_v42  ;;  %v501_v23 = vmul.f32 %v464_v15, %v338_v25  ;;  %v504_v25 = vmul.f32 %v467_v28, %v869_v4 }
  0xb3   : > { %v510_v56 = vadd.f32 %v509_v51, %v495_v48  ;;  %v474_v58 = vadd.f32 %v473_v50, %v459_v37  ;;  %v340_v59 = vpop.f32.mrf.mxu2  ;;  %v352_v26 = vpop.f32.mrf.mxu3 }
  0xb4   : > { %v341_v62 = vadd.f32 %v794_v21, %v340_v59  ;;  %v353_v5 = vadd.f32 %v794_v21, %v352_v26  ;;  %v657_v21 = vsel %vm417_vm14, 1.0, %v697_v47 }
  0xb5   : > { %v475_v2 = vadd.f32 %v474_v58, %v460_v49  ;;  %v511_v3 = vadd.f32 %v510_v56, %v496_v55 }
  0xb6   : > { %366 = vst [vmem:[%s801_s10 + $0x58] sm:$0xff] %v341_v62  ;;  %v465_v19 = vmul.f32 %v657_v21, %v341_v62  ;;  %v469_v41 = vmul.f32 %v661_v0, %v353_v5 }
  0xb7   : > { %v476_v8 = vadd.f32 %v475_v2, %v461_v57  ;;  %v512_v10 = vadd.f32 %v511_v3, %v497_v1  ;;  %370 = vst [vmem:[%s801_s10 + $0x78] sm:$0xff] %v353_v5 }
  0xb8   : > { %v502_v31 = vmul.f32 %v465_v19, %v341_v62  ;;  %v506_v47 = vmul.f32 %v469_v41, %v353_v5 }
  0xb9   : > { %v477_v13 = vadd.f32 %v476_v8, %v462_v61  ;;  %v513_v14 = vadd.f32 %v512_v10, %v498_v9 }
  0xbb   : > { %v514_v17 = vadd.f32 %v513_v14, %v499_v12  ;;  %v478_v18 = vadd.f32 %v477_v13, %v463_v7 }
  0xbd   : > { %v479_v22 = vadd.f32 %v478_v18, %v464_v15  ;;  %v515_v24 = vadd.f32 %v514_v17, %v500_v16 }
  0xbf   : > { %v516_v40 = vadd.f32 %v515_v24, %v501_v23  ;;  %v480_v30 = vadd.f32 %v479_v22, %v465_v19 }
  0xc1   : > { %v481_v33 = vadd.f32 %v480_v30, %v466_v11  ;;  %v517_v34 = vadd.f32 %v516_v40, %v502_v31 }
  0xc3   : > { %v518_v37 = vadd.f32 %v517_v34, %v503_v32  ;;  %v482_v38 = vadd.f32 %v481_v33, %v467_v28 }
  0xc5   : > { %v483_v42 = vadd.f32 %v482_v38, %v468_v35  ;;  %v519_v45 = vadd.f32 %v518_v37, %v504_v25 }
  0xc7   : > { %v520_v46 = vadd.f32 %v519_v45, %v505_v44  ;;  %v484_v48 = vadd.f32 %v483_v42, %v469_v41 }
  0xc9   : > { %v485_v49 = vrot.slane %v484_v48, 4  ;;  %v521_v43 = vadd.f32 %v520_v46, %v506_v47 }
  0xcb   : > { %v486_v50 = vadd.f32 %v485_v49, %v484_v48  ;;  %v522_v51 = vrot.slane %v521_v43, 4 }
  0xcd   : > { %v487_v52 = vrot.slane %v486_v50, 2  ;;  %v523_v53 = vadd.f32 %v522_v51, %v521_v43 }
  0xcf   : > { %v488_v4 = vadd.f32 %v487_v52, %v486_v50  ;;  %v524_v54 = vrot.slane %v523_v53, 2 }
  0xd1   : > { %v489_v55 = vrot.slane %v488_v4, 1  ;;  %v525_v56 = vadd.f32 %v524_v54, %v523_v53 }
  0xd3   : > { %v526_v57 = vrot.slane %v525_v56, 1  ;;  %v490_v36 = vadd.f32 %v489_v55, %v488_v4 }
  0xd5   : > { %v527_v58 = vadd.f32 %v526_v57, %v525_v56 }
  0xd7   : > { %v529_v59 = vsel %vm528_vm2, %v490_v36, %v527_v58 }
  0xd8   : > { %530 = vst [vmem:[%s211_s17] sm:$0x3] %v529_v59 }
  0xd9 PF: > { %s15_s15 = sadd.s32 1, %s695_s15  }
  0xda   : > { %p12_p5 = scmp.ge.s32.totalorder %s15_s15, 6  }
  0xdc   :  { %14 = sbr.rel (!%p12_p5) target bundleno = 1 (0x1), region = 74 }

// kernel: double_conv.5
= control target key start
LH: loop header
LB: loop body
LE: loop exit
PB: predicated region body
PF: predicated region fallthrough
CT: control target
= control target key end

     0   :  { %s367_s12 = smov 0   ;;  %s444_s0 = inlined_call_operand.vmem [shape: f32[384,128], index: 0, kind: input, shape index: {}]   ;;  %s445_s1 = inlined_call_operand.vmem [shape: f32[1,128], index: 1, kind: input, shape index: {}]   ;;  %s446_s2 = inlined_call_operand.vmem [shape: f32[1,128], index: 2, kind: input, shape index: {}]   ;;  %s447_s3 = inlined_call_operand.vmem [shape: f32[384,128], index: 3, kind: output, shape index: {}]  }
   0x1 LB: > { %s318_s13 = sadd.s32 4294967295, %s345_s12   ;;  %p322_p0 = scmp.ge.s32.totalorder %s345_s12, 1  ;;  %s345_s12 = sphi %s367_s12, %s13_s12  }
   0x2   : > { %p138_p1 = scmp.lt.s32.totalorder %s345_s12, 4 }
   0x4   : > { %p139_p2 = pnand %p322_p0, %p138_p1 }
   0x5   : > { %s323_s14 = sshll.u32 (!%p139_p2), %s318_s13, 4 }
   0x6   : > { %142 = sbr.rel (%p139_p2) target bundleno = 37 (0x25), region = 32  ;;  %p163_p3 = scmp.lt.s32.totalorder (!%p139_p2), %s323_s14, 47 }
   0xb   : > { %s449_s14 = smov (!%p163_p3, %s323_s14), 47  ;;  %v337_v0 = vld [vmem:[%s445_s1] ss:$0 sm:$0xff] }
   0xc   : > { %s324_s17 = sshll.u32 %s449_s14, 3  ;;  %v386_v1 = vld [vmem:[%s446_s2] ss:$0 sm:$0xff] }
   0xd   : > { %s381_s20 = scalar_lea.vmem %s444_s0, %s324_s17  ;;  %s402_s25 = scalar_lea.vmem %s447_s3, %s324_s17 }
   0xe   : > { %v174_v2 = vld [vmem:[%s381_s20] sm:$0xff]  ;;  %v175_v3 = vld [vmem:[%s381_s20 + $0x8] sm:$0xff]  ;;  %v176_v4 = vld [vmem:[%s381_s20 + $0x10] sm:$0xff] }
   0xf   : > { %v194_v5 = vmul.f32 %v337_v0, %v174_v2  ;;  %v195_v6 = vmul.f32 %v337_v0, %v175_v3  ;;  %v196_v7 = vmul.f32 %v337_v0, %v176_v4  ;;  %v177_v8 = vld [vmem:[%s381_s20 + $0x18] sm:$0xff]  ;;  %v178_v9 = vld [vmem:[%s381_s20 + $0x20] sm:$0xff]  ;;  %v179_v10 = vld [vmem:[%s381_s20 + $0x28] sm:$0xff] }
  0x10   : > { %v197_v11 = vmul.f32 %v337_v0, %v177_v8  ;;  %v198_v12 = vmul.f32 %v337_v0, %v178_v9  ;;  %v199_v13 = vmul.f32 %v337_v0, %v179_v10  ;;  %v180_v14 = vld [vmem:[%s381_s20 + $0x30] sm:$0xff]  ;;  %v181_v15 = vld [vmem:[%s381_s20 + $0x38] sm:$0xff]  ;;  %v182_v24 = vld [vmem:[%s381_s20 + $0x40] sm:$0xff] }
  0x11   : > { %v214_v16 = vadd.f32 %v386_v1, %v194_v5  ;;  %v215_v17 = vadd.f32 %v386_v1, %v195_v6  ;;  %v216_v18 = vadd.f32 %v386_v1, %v196_v7  ;;  %v200_v19 = vmul.f32 %v337_v0, %v180_v14  ;;  %v183_v25 = vld [vmem:[%s381_s20 + $0x48] sm:$0xff]  ;;  %v184_v26 = vld [vmem:[%s381_s20 + $0x50] sm:$0xff]  ;;  %v185_v31 = vld [vmem:[%s381_s20 + $0x58] sm:$0xff] }
  0x12   : > { %v217_v20 = vadd.f32 %v386_v1, %v197_v11  ;;  %v218_v21 = vadd.f32 %v386_v1, %v198_v12  ;;  %v219_v22 = vadd.f32 %v386_v1, %v199_v13  ;;  %v201_v23 = vmul.f32 %v337_v0, %v181_v15  ;;  %v186_v32 = vld [vmem:[%s381_s20 + $0x60] sm:$0xff]  ;;  %v187_v33 = vld [vmem:[%s381_s20 + $0x68] sm:$0xff]  ;;  %v188_v37 = vld [vmem:[%s381_s20 + $0x70] sm:$0xff] }
  0x13   : > { %v230_v27 = vmax.f32 %v214_v16, 0.0  ;;  %v231_v28 = vmax.f32 %v215_v17, 0.0  ;;  %v232_v29 = vmax.f32 %v216_v18, 0.0  ;;  %v220_v30 = vadd.f32 %v386_v1, %v200_v19  ;;  %v189_v42 = vld [vmem:[%s381_s20 + $0x78] sm:$0xff] }
  0x14   : > { %v233_v34 = vmax.f32 %v217_v20, 0.0  ;;  %v234_v35 = vmax.f32 %v218_v21, 0.0  ;;  %v221_v36 = vadd.f32 %v386_v1, %v201_v23  ;;  %v235_v38 = vmax.f32 %v219_v22, 0.0 }
  0x15   : > { %246 = vst [vmem:[%s402_s25] sm:$0xff] %v230_v27  ;;  %v202_v39 = vmul.f32 %v337_v0, %v182_v24  ;;  %v203_v40 = vmul.f32 %v337_v0, %v183_v25  ;;  %v204_v41 = vmul.f32 %v337_v0, %v184_v26  ;;  %v236_v43 = vmax.f32 %v220_v30, 0.0 }
  0x16   : > { %247 = vst [vmem:[%s402_s25 + $0x8] sm:$0xff] %v231_v28  ;;  %v205_v44 = vmul.f32 %v337_v0, %v185_v31  ;;  %v206_v45 = vmul.f32 %v337_v0, %v186_v32  ;;  %v207_v46 = vmul.f32 %v337_v0, %v187_v33  ;;  %v208_v50 = vmul.f32 %v337_v0, %v188_v37 }
  0x17   : > { %248 = vst [vmem:[%s402_s25 + $0x10] sm:$0xff] %v232_v29  ;;  %v222_v47 = vadd.f32 %v386_v1, %v202_v39  ;;  %v223_v48 = vadd.f32 %v386_v1, %v203_v40  ;;  %v224_v49 = vadd.f32 %v386_v1, %v204_v41  ;;  %v237_v51 = vmax.f32 %v221_v36, 0.0 }
  0x18   : > { %249 = vst [vmem:[%s402_s25 + $0x18] sm:$0xff] %v233_v34  ;;  %v225_v52 = vadd.f32 %v386_v1, %v205_v44  ;;  %v209_v53 = vmul.f32 %v337_v0, %v189_v42  ;;  %v226_v55 = vadd.f32 %v386_v1, %v206_v45  ;;  %v227_v57 = vadd.f32 %v386_v1, %v207_v46 }
  0x19   : > { %250 = vst [vmem:[%s402_s25 + $0x20] sm:$0xff] %v234_v35  ;;  %v238_v54 = vmax.f32 %v222_v47, 0.0  ;;  %v239_v56 = vmax.f32 %v223_v48, 0.0  ;;  %v240_v58 = vmax.f32 %v224_v49, 0.0  ;;  %v228_v59 = vadd.f32 %v386_v1, %v208_v50 }
  0x1a   : > { %251 = vst [vmem:[%s402_s25 + $0x28] sm:$0xff] %v235_v38  ;;  %v241_v60 = vmax.f32 %v225_v52, 0.0  ;;  %v229_v61 = vadd.f32 %v386_v1, %v209_v53  ;;  %v242_v62 = vmax.f32 %v226_v55, 0.0  ;;  %v243_v63 = vmax.f32 %v227_v57, 0.0 }
  0x1b   : > { %252 = vst [vmem:[%s402_s25 + $0x30] sm:$0xff] %v236_v43  ;;  %v244_v0 = vmax.f32 %v228_v59, 0.0 }
  0x1c   : > { %253 = vst [vmem:[%s402_s25 + $0x38] sm:$0xff] %v237_v51  ;;  %v245_v2 = vmax.f32 %v229_v61, 0.0 }
  0x1d   : > { %254 = vst [vmem:[%s402_s25 + $0x40] sm:$0xff] %v238_v54 }
  0x1e   : > { %255 = vst [vmem:[%s402_s25 + $0x48] sm:$0xff] %v239_v56 }
  0x1f   : > { %256 = vst [vmem:[%s402_s25 + $0x50] sm:$0xff] %v240_v58 }
  0x20   : > { %257 = vst [vmem:[%s402_s25 + $0x58] sm:$0xff] %v241_v60 }
  0x21   : > { %258 = vst [vmem:[%s402_s25 + $0x60] sm:$0xff] %v242_v62 }
  0x22   : > { %259 = vst [vmem:[%s402_s25 + $0x68] sm:$0xff] %v243_v63 }
  0x23   : > { %260 = vst [vmem:[%s402_s25 + $0x70] sm:$0xff] %v244_v0 }
  0x24   : > { %261 = vst [vmem:[%s402_s25 + $0x78] sm:$0xff] %v245_v2 }
  0x25 PF: > { %s13_s12 = sadd.s32 1, %s345_s12  }
  0x26   : > { %p10_p4 = scmp.ge.s32.totalorder %s13_s12, 5  }
  0x28   :  { %12 = sbr.rel (!%p10_p4) target bundleno = 1 (0x1), region = 62 }

// kernel: double_conv.4
= control target key start
LH: loop header
LB: loop body
LE: loop exit
PB: predicated region body
PF: predicated region fallthrough
CT: control target
= control target key end

     0   :  { %s856_s21 = smov 0   ;;  %s1140_s0 = inlined_call_operand.vmem [shape: f32[384,72], index: 0, kind: input, shape index: {}]   ;;  %s1141_s1 = inlined_call_operand.vmem [shape: f32[72,128], index: 1, kind: input, shape index: {}]   ;;  %s1142_s2 = inlined_call_operand.vmem [shape: f32[1,128], index: 2, kind: input, shape index: {}]   ;;  %s1143_s3 = inlined_call_operand.vmem [shape: f32[1,72], index: 3, kind: input, shape index: {}]   ;;  %s1144_s4 = inlined_call_operand.vmem [shape: f32[1,72], index: 4, kind: input, shape index: {}]   ;;  %s1145_s5 = inlined_call_operand.vmem [shape: f32[384,128], index: 5, kind: output, shape index: {0}]   ;;  %s1146_s6 = inlined_call_operand.vmem [shape: f32[3,2,128], index: 6, kind: output, shape index: {1}]  }
   0x1 LB: > { %s862_s22 = sadd.s32 4294967295, %s818_s21   ;;  %p732_p0 = scmp.ge.s32.totalorder %s818_s21, 1  ;;  %s818_s21 = sphi %s856_s21, %s17_s21  }
   0x2   : > { %p216_p1 = scmp.lt.s32.totalorder %s818_s21, 4 }
   0x4   : > { %p217_p2 = pnand %p732_p0, %p216_p1 }
   0x5   : > { %s733_s27 = sshll.u32 (!%p217_p2), %s862_s22, 4  ;;  %p262_p4 = scmp.lt.s32.totalorder (!%p217_p2), %s862_s22, 2 }
   0x6   : > { %220 = sbr.rel (%p217_p2) target bundleno = 225 (0xe1), region = 40  ;;  %p251_p3 = scmp.lt.s32.totalorder (!%p217_p2), %s733_s27, 47 }
   0xb   : > { %v346_v0 = vld [vmem:[%s1141_s1 + $0x40] sm:$0xff]  ;;  %v345_v1 = vld [vmem:[%s1141_s1 + $0x38] sm:$0xff]  ;;  %v344_v2 = vld [vmem:[%s1141_s1 + $0x30] sm:$0xff]  ;;  %s1148_s27 = smov (!%p251_p3, %s733_s27), 47  ;;  %vm351_vm0 = vcmask 588800  }
   0xc   : > { %407 = vmatpush.msra.mxu0 %v346_v0  ;;  %773 = vmatpush.msra.mxu1 %v346_v0  ;;  %v343_v3 = vld [vmem:[%s1141_s1 + $0x28] sm:$0xff]  ;;  %v884_v4 = vld [vmem:[%s1143_s3] ss:$0 sm:$0xff]  ;;  %s734_s10 = sshll.u32 %s1148_s27, 3  ;;  %v341_v9 = vld [vmem:[%s1141_s1 + $0x18] sm:$0xff]  ;;  %s754_s27 = sshll.u32 %s862_s22, 7 }
   0xd   : > { %774 = vmatpush.msra.mxu2 %v346_v0  ;;  %775 = vmatpush.msra.mxu3 %v346_v0  ;;  %v342_v5 = vld [vmem:[%s1141_s1 + $0x20] sm:$0xff]  ;;  %s895_s15 = scalar_lea.vmem %s1140_s0, %s734_s10  ;;  %v340_v14 = vld [vmem:[%s1141_s1 + $0x10] sm:$0xff]  ;;  %v339_v20 = vld [vmem:[%s1141_s1 + $0x8] sm:$0xff]  ;;  %s988_s9 = scalar_lea.vmem %s1145_s5, %s734_s10 }
   0xe   : > { %408 = vmatpush.msra.mxu0 %v345_v1  ;;  %776 = vmatpush.msra.mxu1 %v345_v1  ;;  %v900_v6 = vld [vmem:[%s1144_s4] ss:$0 sm:$0xff]  ;;  %v267_v18 = vld [vmem:[%s895_s15 + $0x8] sm:$0xff]  ;;  %v268_v37 = vld [vmem:[%s895_s15 + $0x10] sm:$0xff]  ;;  %s1150_s22 = smov (!%p262_p4, %s862_s22), 2 }
   0xf   : > { %777 = vmatpush.msra.mxu2 %v345_v1  ;;  %778 = vmatpush.msra.mxu3 %v345_v1  ;;  %v266_v7 = vld [vmem:[%s895_s15] sm:$0xff]  ;;  %v271_v19 = vld [vmem:[%s895_s15 + $0x28] sm:$0xff]  ;;  %v287_v28 = vmul.f32 %v884_v4, %v267_v18  ;;  %v272_v38 = vld [vmem:[%s895_s15 + $0x30] sm:$0xff]  ;;  %v288_v45 = vmul.f32 %v884_v4, %v268_v37  ;;  %v820_v37 = vmov 0.0   ;;  %s737_s10 = sshll.u32 %s1150_s22, 1 }
  0x10   : > { %409 = vmatpush.msra.mxu0 %v344_v2  ;;  %779 = vmatpush.msra.mxu1 %v344_v2  ;;  %v270_v8 = vld [vmem:[%s895_s15 + $0x20] sm:$0xff]  ;;  %v286_v10 = vmul.f32 %v884_v4, %v266_v7  ;;  %v275_v22 = vld [vmem:[%s895_s15 + $0x48] sm:$0xff]  ;;  %v291_v29 = vmul.f32 %v884_v4, %v271_v19  ;;  %v276_v41 = vld [vmem:[%s895_s15 + $0x50] sm:$0xff]  ;;  %v292_v46 = vmul.f32 %v884_v4, %v272_v38  ;;  %v1004_v19 = vstv %s754_s27  ;;  %s265_s13 = scalar_lea.vmem %s1146_s6, %s737_s10 }
  0x11   : > { %780 = vmatpush.msra.mxu2 %v344_v2  ;;  %781 = vmatpush.msra.mxu3 %v344_v2  ;;  %v290_v11 = vmul.f32 %v884_v4, %v270_v8  ;;  %v274_v12 = vld [vmem:[%s895_s15 + $0x40] sm:$0xff]  ;;  %v279_v24 = vld [vmem:[%s895_s15 + $0x68] sm:$0xff]  ;;  %v295_v32 = vmul.f32 %v884_v4, %v275_v22  ;;  %v307_v35 = vadd.f32 %v900_v6, %v287_v28  ;;  %v280_v42 = vld [vmem:[%s895_s15 + $0x70] sm:$0xff] }
  0x12   : > { %410 = vmatpush.msra.mxu0 %v343_v3  ;;  %782 = vmatpush.msra.mxu1 %v343_v3  ;;  %v294_v13 = vmul.f32 %v884_v4, %v274_v12  ;;  %v306_v15 = vadd.f32 %v900_v6, %v286_v10  ;;  %v278_v17 = vld [vmem:[%s895_s15 + $0x60] sm:$0xff]  ;;  %v299_v33 = vmul.f32 %v884_v4, %v279_v24  ;;  %v269_v53 = vld [vmem:[%s895_s15 + $0x18] sm:$0xff] }
  0x13   : > { %783 = vmatpush.msra.mxu2 %v343_v3  ;;  %784 = vmatpush.msra.mxu3 %v343_v3  ;;  %v310_v16 = vadd.f32 %v900_v6, %v290_v11  ;;  %v298_v23 = vmul.f32 %v884_v4, %v278_v17  ;;  %v338_v25 = vld [vmem:[%s1141_s1] sm:$0xff]  ;;  %v311_v36 = vadd.f32 %v900_v6, %v291_v29  ;;  %v323_v43 = vmax.f32 %v307_v35, 0.0  ;;  %v273_v54 = vld [vmem:[%s895_s15 + $0x38] sm:$0xff] }
  0x14   : > { %411 = vmatpush.msra.mxu0 %v342_v5  ;;  %785 = vmatpush.msra.mxu1 %v342_v5  ;;  %v314_v21 = vadd.f32 %v900_v6, %v294_v13  ;;  %v322_v26 = vmax.f32 %v306_v15, 0.0  ;;  %v315_v39 = vadd.f32 %v900_v6, %v295_v32  ;;  %v319_v40 = vadd.f32 %v900_v6, %v299_v33  ;;  %v277_v57 = vld [vmem:[%s895_s15 + $0x58] sm:$0xff]  ;;  %v981_v12 = vld [vmem:[%s1142_s2] ss:$0 sm:$0xff] }
  0x15   : > { %786 = vmatpush.msra.mxu2 %v342_v5  ;;  %787 = vmatpush.msra.mxu3 %v342_v5  ;;  %v326_v27 = vmax.f32 %v310_v16, 0.0  ;;  %v318_v30 = vadd.f32 %v900_v6, %v298_v23  ;;  %v327_v44 = vmax.f32 %v311_v36, 0.0  ;;  %v296_v48 = vmul.f32 %v884_v4, %v276_v41  ;;  %v281_v58 = vld [vmem:[%s895_s15 + $0x78] sm:$0xff] }
  0x16   : > { %412 = vmatpush.msra.mxu0 %v341_v9  ;;  %788 = vmatpush.msra.mxu1 %v341_v9  ;;  %v330_v31 = vmax.f32 %v314_v21, 0.0  ;;  %v331_v47 = vmax.f32 %v315_v39, 0.0  ;;  %v335_v49 = vmax.f32 %v319_v40, 0.0  ;;  %v300_v50 = vmul.f32 %v884_v4, %v280_v42 }
  0x17   : > { %789 = vmatpush.msra.mxu2 %v341_v9  ;;  %790 = vmatpush.msra.mxu3 %v341_v9  ;;  %v334_v34 = vmax.f32 %v318_v30, 0.0  ;;  %v308_v51 = vadd.f32 %v900_v6, %v288_v45  ;;  %v312_v52 = vadd.f32 %v900_v6, %v292_v46  ;;  %v316_v55 = vadd.f32 %v900_v6, %v296_v48 }
  0x18   : > { %413 = vmatpush.msra.mxu0 %v340_v14  ;;  %791 = vmatpush.msra.mxu1 %v340_v14  ;;  %v320_v56 = vadd.f32 %v900_v6, %v300_v50  ;;  %v289_v61 = vmul.f32 %v884_v4, %v269_v53  ;;  %v293_v62 = vmul.f32 %v884_v4, %v273_v54  ;;  %v482_v13 = vlaneseq }
  0x19   : > { %792 = vmatpush.msra.mxu2 %v340_v14  ;;  %793 = vmatpush.msra.mxu3 %v340_v14  ;;  %v324_v59 = vmax.f32 %v308_v51, 0.0  ;;  %v328_v60 = vmax.f32 %v312_v52, 0.0  ;;  %v332_v63 = vmax.f32 %v316_v55, 0.0  ;;  %v297_v0 = vmul.f32 %v884_v4, %v277_v57 }
  0x1a   : > { %414 = vmatpush.msra.mxu0 %v339_v20  ;;  %794 = vmatpush.msra.mxu1 %v339_v20  ;;  %v336_v1 = vmax.f32 %v320_v56, 0.0  ;;  %v301_v2 = vmul.f32 %v884_v4, %v281_v58  ;;  %v309_v3 = vadd.f32 %v900_v6, %v289_v61  ;;  %v313_v5 = vadd.f32 %v900_v6, %v293_v62 }
  0x1b   : > { %795 = vmatpush.msra.mxu2 %v339_v20  ;;  %796 = vmatpush.msra.mxu3 %v339_v20  ;;  %v317_v7 = vadd.f32 %v900_v6, %v297_v0  ;;  %v998_v17 = vshrl.u32 %v482_v13, 7 }
  0x1c   : > { %415 = vmatpush.msra.mxu0 %v338_v25  ;;  %797 = vmatpush.msra.mxu1 %v338_v25  ;;  %v321_v8 = vadd.f32 %v900_v6, %v301_v2  ;;  %v325_v9 = vmax.f32 %v309_v3, 0.0  ;;  %v329_v10 = vmax.f32 %v313_v5, 0.0 }
  0x1d   : > { %738 = vmatmul.msk.f32.vlgmr.msra.gmra.mxu0 %vm351_vm0, %v322_v26  ;;  %742 = vmatmul.msk.f32.vlgmr.msra.gmra.mxu1 %vm351_vm0, %v326_v27  ;;  %v333_v4 = vmax.f32 %v317_v7, 0.0  ;;  %v484_v18 = vadd.s32 8, %v998_v17  ;;  %v485_v20 = vadd.s32 16, %v998_v17  ;;  %v500_v27 = vadd.s32 %v1004_v19, %v998_v17 }
  0x1e   : > { %798 = vmatpush.msra.mxu2 %v338_v25  ;;  %799 = vmatpush.msra.mxu3 %v338_v25  ;;  %v337_v11 = vmax.f32 %v321_v8, 0.0  ;;  %v487_v28 = vadd.s32 32, %v998_v17  ;;  %v488_v32 = vadd.s32 40, %v998_v17  ;;  %v491_v36 = vadd.s32 64, %v998_v17 }
  0x1f   : > { %746 = vmatmul.msk.f32.vlgmr.msra.gmra.mxu2 %vm351_vm0, %v330_v31  ;;  %750 = vmatmul.msk.f32.vlgmr.msra.gmra.mxu3 %vm351_vm0, %v334_v34  ;;  %v501_v24 = vadd.s32 %v1004_v19, %v484_v18  ;;  %v502_v31 = vadd.s32 %v1004_v19, %v485_v20  ;;  %v486_v34 = vadd.s32 24, %v998_v17  ;;  %vm516_vm2 = vcmp.lt.s32.totalorder %v500_v27, 288 }
  0x20   : > { %v504_v35 = vadd.s32 %v1004_v19, %v487_v28  ;;  %v505_v39 = vadd.s32 %v1004_v19, %v488_v32  ;;  %v489_v42 = vadd.s32 48, %v998_v17  ;;  %v490_v51 = vadd.s32 56, %v998_v17 }
  0x21   : > { %vm517_vm1 = vcmp.lt.s32.totalorder %v501_v24, 288  ;;  %vm518_vm3 = vcmp.lt.s32.totalorder %v502_v31, 288  ;;  %v508_v53 = vadd.s32 %v1004_v19, %v491_v36  ;;  %v495_v55 = vadd.s32 96, %v998_v17 }
  0x22   : > { %v756_v38 = vsel %vm517_vm1, 1.0, %v820_v37  ;;  %vm520_vm4 = vcmp.lt.s32.totalorder %v504_v35, 288  ;;  %vm521_vm5 = vcmp.lt.s32.totalorder %v505_v39, 288  ;;  %v506_v56 = vadd.s32 %v1004_v19, %v489_v42 }
  0x23   : > { %v759_v61 = vsel %vm520_vm4, 1.0, %v820_v37  ;;  %v507_v62 = vadd.s32 %v1004_v19, %v490_v51  ;;  %v760_v0 = vsel %vm521_vm5, 1.0, %v820_v37  ;;  %vm524_vm7 = vcmp.lt.s32.totalorder %v508_v53, 288 }
  0x24   : > { %vm522_vm8 = vcmp.lt.s32.totalorder %v506_v56, 288  ;;  %v493_v7 = vadd.s32 80, %v998_v17  ;;  %v494_v18 = vadd.s32 88, %v998_v17  ;;  %v498_v53 = vadd.s32 120, %v998_v17 }
  0x25   : > { %739 = vmatmul.msk.f32.gmra.mxu0 %vm351_vm0, %v323_v43  ;;  %743 = vmatmul.msk.f32.gmra.mxu1 %vm351_vm0, %v327_v44  ;;  %v492_v43 = vadd.s32 72, %v998_v17  ;;  %v755_v44 = vsel %vm516_vm2, 1.0, %v820_v37  ;;  %vm523_vm10 = vcmp.lt.s32.totalorder %v507_v62, 288  ;;  %vm638_vm1 = vcmask 1040384  }
  0x26   : > { %v510_v24 = vadd.s32 %v1004_v19, %v493_v7  ;;  %v762_v35 = vsel %vm523_vm10, 1.0, %v820_v37  ;;  %v511_v36 = vadd.s32 %v1004_v19, %v494_v18 }
  0x27   : > { %747 = vmatmul.msk.f32.gmra.mxu2 %vm351_vm0, %v331_v47  ;;  %751 = vmatmul.msk.f32.gmra.mxu3 %vm351_vm0, %v335_v49  ;;  %v503_v47 = vadd.s32 %v1004_v19, %v486_v34  ;;  %v757_v49 = vsel %vm518_vm3, 1.0, %v820_v37  ;;  %v509_v57 = vadd.s32 %v1004_v19, %v492_v43  ;;  %v763_v34 = vsel %vm524_vm7, 1.0, %v820_v37 }
  0x28   : > { %vm526_vm12 = vcmp.lt.s32.totalorder %v510_v24, 288  ;;  %vm527_vm13 = vcmp.lt.s32.totalorder %v511_v36, 288 }
  0x29   : > { %vm519_vm6 = vcmp.lt.s32.totalorder %v503_v47, 288  ;;  %vm525_vm9 = vcmp.lt.s32.totalorder %v509_v57, 288 }
  0x2a   : > { %v758_v3 = vsel %vm519_vm6, 1.0, %v820_v37  ;;  %v764_v42 = vsel %vm525_vm9, 1.0, %v820_v37 }
  0x2d   : > { %740 = vmatmul.msk.f32.gmra.mxu0 %vm351_vm0, %v324_v59  ;;  %744 = vmatmul.msk.f32.gmra.mxu1 %vm351_vm0, %v328_v60 }
  0x2f   : > { %748 = vmatmul.msk.f32.gmra.mxu2 %vm351_vm0, %v332_v63  ;;  %752 = vmatmul.msk.f32.gmra.mxu3 %vm351_vm0, %v336_v1  ;;  %v1068_v1 = vadd.s32 %v1004_v19, %v495_v55 }
  0x31   : > { %vm528_vm11 = vcmp.lt.s32.totalorder %v1068_v1, 288 }
  0x35   : > { %741 = vmatmul.msk.f32.gmra.mxu0 %vm351_vm0, %v325_v9  ;;  %745 = vmatmul.msk.f32.gmra.mxu1 %vm351_vm0, %v329_v10 }
  0x37   : > { %749 = vmatmul.msk.f32.gmra.mxu2 %vm351_vm0, %v333_v4  ;;  %753 = vmatmul.msk.f32.gmra.mxu3 %vm351_vm0, %v337_v11 }
  0x9a   : > { %v417_v6 = vpop.f32.mrf.mxu0  ;;  %v429_v14 = vpop.f32.mrf.mxu1 }
  0x9b   : > { %v991_v15 = vadd.f32 %v981_v12, %v417_v6  ;;  %v994_v16 = vadd.f32 %v981_v12, %v429_v14 }
  0x9d   : > { %465 = vst [vmem:[%s988_s9] sm:$0xff] %v991_v15  ;;  %v564_v59 = vmul.f32 %v755_v44, %v991_v15  ;;  %v568_v6 = vmul.f32 %v759_v61, %v994_v16  ;;  %v497_v44 = vadd.s32 112, %v998_v17 }
  0x9e   : > { %469 = vst [vmem:[%s988_s9 + $0x20] sm:$0xff] %v994_v16 }
  0x9f   : > { %v601_v8 = vmul.f32 %v564_v59, %v991_v15 }
  0xa2   : > { %v420_v21 = vpop.f32.mrf.mxu0  ;;  %v432_v22 = vpop.f32.mrf.mxu1 }
  0xa3   : > { %v421_v23 = vadd.f32 %v981_v12, %v420_v21  ;;  %v441_v25 = vpop.f32.mrf.mxu2  ;;  %v453_v26 = vpop.f32.mrf.mxu3  ;;  %v1013_v29 = vadd.f32 %v981_v12, %v432_v22 }
  0xa4   : > { %v1017_v30 = vadd.f32 %v981_v12, %v441_v25  ;;  %v1024_v33 = vadd.f32 %v981_v12, %v453_v26  ;;  %v496_v25 = vadd.s32 104, %v998_v17  ;;  %v767_v17 = vsel %vm528_vm11, 1.0, %v820_v37 }
  0xa5   : > { %466 = vst [vmem:[%s988_s9 + $0x8] sm:$0xff] %v421_v23  ;;  %v565_v52 = vmul.f32 %v756_v38, %v421_v23  ;;  %v569_v27 = vmul.f32 %v760_v0, %v1013_v29  ;;  %v605_v38 = vmul.f32 %v568_v6, %v994_v16 }
  0xa6   : > { %470 = vst [vmem:[%s988_s9 + $0x28] sm:$0xff] %v1013_v29  ;;  %v513_v43 = vadd.s32 %v1004_v19, %v496_v25  ;;  %v572_v51 = vmul.f32 %v763_v34, %v1017_v30  ;;  %v576_v1 = vmul.f32 %v767_v17, %v1024_v33 }
  0xa7   : > { %473 = vst [vmem:[%s988_s9 + $0x40] sm:$0xff] %v1017_v30  ;;  %v602_v63 = vmul.f32 %v565_v52, %v421_v23  ;;  %v580_v9 = vadd.f32 %v565_v52, %v564_v59  ;;  %v761_v23 = vsel %vm522_vm8, 1.0, %v820_v37 }
  0xa8   : > { %477 = vst [vmem:[%s988_s9 + $0x60] sm:$0xff] %v1024_v33  ;;  %vm529_vm14 = vcmp.lt.s32.totalorder %v513_v43, 288 }
  0xa9   : > { %v617_v20 = vadd.f32 %v602_v63, %v601_v8 }
  0xaa   : > { %v423_v40 = vpop.f32.mrf.mxu0  ;;  %v435_v41 = vpop.f32.mrf.mxu1 }
  0xab   : > { %v424_v45 = vadd.f32 %v981_v12, %v423_v40  ;;  %v444_v46 = vpop.f32.mrf.mxu2  ;;  %v456_v48 = vpop.f32.mrf.mxu3  ;;  %v1042_v50 = vadd.f32 %v981_v12, %v435_v41 }
  0xac   : > { %v1048_v54 = vadd.f32 %v981_v12, %v444_v46  ;;  %v1056_v58 = vadd.f32 %v981_v12, %v456_v48 }
  0xad   : > { %467 = vst [vmem:[%s988_s9 + $0x10] sm:$0xff] %v424_v45  ;;  %v566_v60 = vmul.f32 %v757_v49, %v424_v45  ;;  %v570_v39 = vmul.f32 %v761_v23, %v1042_v50 }
  0xae   : > { %471 = vst [vmem:[%s988_s9 + $0x30] sm:$0xff] %v1042_v50  ;;  %v573_v61 = vmul.f32 %v764_v42, %v1048_v54 }
  0xaf   : > { %474 = vst [vmem:[%s988_s9 + $0x48] sm:$0xff] %v1048_v54  ;;  %v603_v10 = vmul.f32 %v566_v60, %v424_v45  ;;  %v581_v21 = vadd.f32 %v580_v9, %v566_v60  ;;  %v606_v45 = vmul.f32 %v569_v27, %v1013_v29  ;;  %v607_v55 = vmul.f32 %v570_v39, %v1042_v50 }
  0xb0   : > { %478 = vst [vmem:[%s988_s9 + $0x68] sm:$0xff] %v1056_v58  ;;  %v765_v29 = vsel %vm526_vm12, 1.0, %v820_v37  ;;  %v514_v60 = vadd.s32 %v1004_v19, %v497_v44  ;;  %v515_v50 = vadd.s32 %v1004_v19, %v498_v53  ;;  %v610_v8 = vmul.f32 %v573_v61, %v1048_v54 }
  0xb1   : > { %v618_v28 = vadd.f32 %v617_v20, %v603_v10 }
  0xb2   : > { %v426_v2 = vpop.f32.mrf.mxu0  ;;  %v438_v5 = vpop.f32.mrf.mxu1  ;;  %vm530_vm15 = vcmp.lt.s32.totalorder %v514_v60, 288  ;;  %vm531_vm0 = vcmp.lt.s32.totalorder %v515_v50, 288 }
  0xb3   : > { %v427_v4 = vadd.f32 %v981_v12, %v426_v2  ;;  %v447_v11 = vpop.f32.mrf.mxu2  ;;  %v459_v13 = vpop.f32.mrf.mxu3  ;;  %v439_v14 = vadd.f32 %v981_v12, %v438_v5  ;;  %v609_v2 = vmul.f32 %v572_v51, %v1017_v30  ;;  %v769_v19 = vsel %vm530_vm15, 1.0, %v820_v37 }
  0xb4   : > { %v448_v15 = vadd.f32 %v981_v12, %v447_v11  ;;  %v1085_v26 = vadd.f32 %v981_v12, %v459_v13  ;;  %v768_v11 = vsel %vm529_vm14, 1.0, %v820_v37  ;;  %v770_v54 = vsel %vm531_vm0, 1.0, %v820_v37 }
  0xb5   : > { %468 = vst [vmem:[%s988_s9 + $0x18] sm:$0xff] %v427_v4  ;;  %v567_v22 = vmul.f32 %v758_v3, %v427_v4  ;;  %v571_v47 = vmul.f32 %v762_v35, %v439_v14  ;;  %v577_v18 = vmul.f32 %v768_v11, %v1056_v58 }
  0xb6   : > { %472 = vst [vmem:[%s988_s9 + $0x38] sm:$0xff] %v439_v14  ;;  %v574_v7 = vmul.f32 %v765_v29, %v448_v15  ;;  %v578_v25 = vmul.f32 %v769_v19, %v1085_v26 }
  0xb7   : > { %v582_v31 = vadd.f32 %v581_v21, %v567_v22  ;;  %v604_v32 = vmul.f32 %v567_v22, %v427_v4  ;;  %475 = vst [vmem:[%s988_s9 + $0x50] sm:$0xff] %v448_v15  ;;  %v608_v63 = vmul.f32 %v571_v47, %v439_v14  ;;  %v613_v22 = vmul.f32 %v576_v1, %v1024_v33 }
  0xb8   : > { %479 = vst [vmem:[%s988_s9 + $0x70] sm:$0xff] %v1085_v26  ;;  %v615_v34 = vmul.f32 %v578_v25, %v1085_v26 }
  0xb9   : > { %v583_v40 = vadd.f32 %v582_v31, %v568_v6  ;;  %v619_v41 = vadd.f32 %v618_v28, %v604_v32  ;;  %v611_v6 = vmul.f32 %v574_v7, %v448_v15  ;;  %v614_v15 = vmul.f32 %v577_v18, %v1056_v58 }
  0xbb   : > { %v620_v46 = vadd.f32 %v619_v41, %v605_v38  ;;  %v584_v48 = vadd.f32 %v583_v40, %v569_v27  ;;  %v450_v49 = vpop.f32.mrf.mxu2  ;;  %v462_v16 = vpop.f32.mrf.mxu3 }
  0xbc   : > { %v451_v52 = vadd.f32 %v981_v12, %v450_v49  ;;  %v463_v59 = vadd.f32 %v981_v12, %v462_v16  ;;  %v766_v12 = vsel %vm527_vm13, 1.0, %v820_v37 }
  0xbd   : > { %v585_v56 = vadd.f32 %v584_v48, %v570_v39  ;;  %v621_v57 = vadd.f32 %v620_v46, %v606_v45 }
  0xbe   : > { %476 = vst [vmem:[%s988_s9 + $0x58] sm:$0xff] %v451_v52  ;;  %v575_v4 = vmul.f32 %v766_v12, %v451_v52  ;;  %v579_v31 = vmul.f32 %v770_v54, %v463_v59 }
  0xbf   : > { %v586_v62 = vadd.f32 %v585_v56, %v571_v47  ;;  %v622_v0 = vadd.f32 %v621_v57, %v607_v55  ;;  %480 = vst [vmem:[%s988_s9 + $0x78] sm:$0xff] %v463_v59 }
  0xc0   : > { %v612_v21 = vmul.f32 %v575_v4, %v451_v52  ;;  %v616_v37 = vmul.f32 %v579_v31, %v463_v59 }
  0xc1   : > { %v587_v3 = vadd.f32 %v586_v62, %v572_v51  ;;  %v623_v5 = vadd.f32 %v622_v0, %v608_v63 }
  0xc3   : > { %v624_v9 = vadd.f32 %v623_v5, %v609_v2  ;;  %v588_v10 = vadd.f32 %v587_v3, %v573_v61 }
  0xc5   : > { %v589_v13 = vadd.f32 %v588_v10, %v574_v7  ;;  %v625_v14 = vadd.f32 %v624_v9, %v610_v8 }
  0xc7   : > { %v626_v30 = vadd.f32 %v625_v14, %v611_v6  ;;  %v590_v20 = vadd.f32 %v589_v13, %v575_v4 }
  0xc9   : > { %v591_v23 = vadd.f32 %v590_v20, %v576_v1  ;;  %v627_v24 = vadd.f32 %v626_v30, %v612_v21 }
  0xcb   : > { %v628_v27 = vadd.f32 %v627_v24, %v613_v22  ;;  %v592_v28 = vadd.f32 %v591_v23, %v577_v18 }
  0xcd   : > { %v593_v32 = vadd.f32 %v592_v28, %v578_v25  ;;  %v629_v35 = vadd.f32 %v628_v27, %v614_v15 }
  0xcf   : > { %v630_v36 = vadd.f32 %v629_v35, %v615_v34  ;;  %v594_v38 = vadd.f32 %v593_v32, %v579_v31 }
  0xd1   : > { %v595_v39 = vrot.slane %v594_v38, 4  ;;  %v631_v33 = vadd.f32 %v630_v36, %v616_v37 }
  0xd3   : > { %v596_v40 = vadd.f32 %v595_v39, %v594_v38  ;;  %v632_v41 = vrot.slane %v631_v33, 4 }
  0xd5   : > { %v597_v42 = vrot.slane %v596_v40, 2  ;;  %v633_v43 = vadd.f32 %v632_v41, %v631_v33 }
  0xd7   : > { %v598_v58 = vadd.f32 %v597_v42, %v596_v40  ;;  %v634_v44 = vrot.slane %v633_v43, 2 }
  0xd9   : > { %v599_v45 = vrot.slane %v598_v58, 1  ;;  %v635_v46 = vadd.f32 %v634_v44, %v633_v43 }
  0xdb   : > { %v636_v47 = vrot.slane %v635_v46, 1  ;;  %v600_v26 = vadd.f32 %v599_v45, %v598_v58 }
  0xdd   : > { %v637_v48 = vadd.f32 %v636_v47, %v635_v46 }
  0xdf   : > { %v639_v49 = vsel %vm638_vm1, %v600_v26, %v637_v48 }
  0xe0   : > { %640 = vst [vmem:[%s265_s13] sm:$0x3] %v639_v49 }
  0xe1 PF: > { %s17_s21 = sadd.s32 1, %s818_s21  }
  0xe2   : > { %p14_p5 = scmp.ge.s32.totalorder %s17_s21, 5  }
  0xe4   :  { %16 = sbr.rel (!%p14_p5) target bundleno = 1 (0x1), region = 82 }

</bundles_post_ra>
